<compile_context>
chip_gen: v5e
topology: v5e:2x2
jax: 0.10.0
libtpu: 0.0.40
codegen_flags: <defaults>
</compile_context>

<pallas_src>
import jax
import jax.numpy as jnp
from jax.experimental import pallas as pl
from jax.experimental.pallas import tpu as pltpu

D_IN = 30      # breast-cancer feature count
WPAD = 64      # padded slab edge (max hidden width)


def mlp_kernel(x_ref, w_ref, b_ref, o_ref):
    x = x_ref[...]                                   # [R, 30]

    # ---- layer 1: [R,30] @ [30,64] on the MXU ----
    w1 = w_ref[0][:D_IN, :]                          # static slice of the slab
    h = jnp.dot(x, w1, preferred_element_type=jnp.float32) + b_ref[0]
    h = jnp.maximum(h, 0.0)

    # ---- layer 2: [R,64] @ [64,64] (cols 32: are zero padding) ----
    h = jnp.dot(h, w_ref[1], preferred_element_type=jnp.float32) + b_ref[1]
    h = jnp.maximum(h, 0.0)

    # ---- layer 3: [R,64] @ [64,64] (rows 32:, cols 16: are zero padding) ----
    h = jnp.dot(h, w_ref[2], preferred_element_type=jnp.float32) + b_ref[2]
    h = jnp.maximum(h, 0.0)

    # ---- layer 4 (16 -> 1): VPU multiply + lane reduce, skip the MXU ----
    w4_row = w_ref[3][0:1, :]                        # [1, 64]; W4^T packed in row 0
    b4 = b_ref[3][0:1, 0:1]                          # [1, 1]
    logit = jnp.sum(h * w4_row, axis=-1, keepdims=True) + b4     # [R, 1]

    # ---- numerically stable sigmoid (matches jax.nn.sigmoid) ----
    e = jnp.exp(-jnp.abs(logit))                     # EUP, never overflows
    sig_abs = 1.0 / (1.0 + e)                        # sigmoid(|logit|)
    o_ref[...] = jnp.where(logit >= 0, sig_abs, 1.0 - sig_abs)


def _round_up(n, m):
    return ((n + m - 1) // m) * m


def pack_params(params):
    """Pack 4 (W[in,out], b[1,out]) pairs into one weight slab + one bias slab."""
    w_slab = jnp.zeros((4, WPAD, WPAD), jnp.float32)
    b_slab = jnp.zeros((4, 1, WPAD), jnp.float32)
    for l, (w, b) in enumerate(params):
        if l < 3:
            w_slab = w_slab.at[l, : w.shape[0], : w.shape[1]].set(w)
        else:
            # final [16,1] layer stored transposed (row 0 = W4^T) so the kernel
            # can do a lane-wise multiply+reduce instead of an MXU matmul.
            w_slab = w_slab.at[l, 0:1, : w.shape[0]].set(w.T)
        b_slab = b_slab.at[l, 0:1, : b.shape[1]].set(b)
    return w_slab, b_slab


def mlp_forward(x, params, block_rows=256):
    """x: [B, 30] float32. params: list of 4 (W[in,out], b[1,out]) pairs."""
    B, d_in = x.shape
    assert d_in == D_IN
    w_slab, b_slab = pack_params(params)

    # Row-block the batch; pad B up to a whole number of blocks.
    # (Use 512-1024 row blocks for very large batches; 256 keeps padding small
    #  here and stays far inside v7x's 64 MiB VMEM / 32 MiB scoped default.)
    block_rows = min(block_rows, _round_up(B, 8))
    b_pad = _round_up(B, block_rows)
    if b_pad != B:
        x = jnp.pad(x, ((0, b_pad - B), (0, 0)))
    grid = (b_pad // block_rows,)

    out = pl.pallas_call(
        mlp_kernel,
        out_shape=jax.ShapeDtypeStruct((b_pad, 1), jnp.float32),
        grid=grid,
        in_specs=[
            pl.BlockSpec((block_rows, D_IN), lambda i: (i, 0)),   # batch-tiled x
            pl.BlockSpec((4, WPAD, WPAD), lambda i: (0, 0, 0)),   # resident weights
            pl.BlockSpec((4, 1, WPAD), lambda i: (0, 0, 0)),      # resident biases
        ],
        out_specs=pl.BlockSpec((block_rows, 1), lambda i: (i, 0)),
        compiler_params=pltpu.CompilerParams(
            dimension_semantics=("parallel",),
        ),
    )(x, w_slab, b_slab)
    return out[:B]


def init_params(key, input_dim, output_dim):
    """Deterministic init matching PyTorch nn.Linear default (U[-1/sqrt(fan_in), +])."""
    dims = [input_dim, 64, 32, 16, output_dim]
    params = []
    for i in range(4):
        fan_in, fan_out = dims[i], dims[i + 1]
        key, kw, kb = jax.random.split(key, 3)
        bound = 1.0 / jnp.sqrt(float(fan_in))
        w = jax.random.uniform(kw, (fan_in, fan_out), jnp.float32, -bound, bound)
        b = jax.random.uniform(kb, (1, fan_out), jnp.float32, -bound, bound)
        params.append((w, b))
    return params


if __name__ == "__main__":
    key = jax.random.PRNGKey(0)
    kx, kp = jax.random.split(key)

    # breast-cancer dataset shape: 569 samples x 30 features, binary output.
    B, INPUT_DIM, OUTPUT_DIM = 569, 30, 1
    x = jax.random.normal(kx, (B, INPUT_DIM), dtype=jnp.float32)
    params = init_params(kp, INPUT_DIM, OUTPUT_DIM)

    out = jax.block_until_ready(mlp_forward(x, params))

    # Reference check in plain JAX
    ref = x
    for i, (w, b) in enumerate(params):
        ref = ref @ w + b
        if i < 3:
            ref = jnp.maximum(ref, 0.0)
    ref = jax.nn.sigmoid(ref)

    assert out.shape == (B, OUTPUT_DIM)
    assert jnp.allclose(out, ref, atol=1e-5), "mismatch vs reference"

    print("KERNEL_OK")
</pallas_src>

<mosaic_0001>
module attributes {stable_mosaic.version = 11 : i64} {
  func.func @mlp_kernel(%arg0: i32, %arg1: memref<256x30xf32, #tpu.memory_space<vmem>>, %arg2: memref<4x64x64xf32, #tpu.memory_space<vmem>>, %arg3: memref<4x1x64xf32, #tpu.memory_space<vmem>>, %arg4: memref<256x1xf32, #tpu.memory_space<vmem>>) attributes {dimension_semantics = [#tpu.dimension_semantics<parallel>], iteration_bounds = array<i64: 3>, scalar_prefetch = 0 : i64, scratch_operands = 0 : i64, tpu.core_type = #tpu.core_type<tc>, window_params = [{transform_indices = @transform_0, window_bounds = array<i64: 256, 30>}, {pipeline_mode = #tpu.pipeline_mode<synchronous>, transform_indices = @transform_1, window_bounds = array<i64: 4, 64, 64>}, {pipeline_mode = #tpu.pipeline_mode<synchronous>, transform_indices = @transform_2, window_bounds = array<i64: 4, 1, 64>}, {transform_indices = @transform_3, window_bounds = array<i64: 256, 1>}]} {
    %c0 = arith.constant 0 : index
    %c0_0 = arith.constant 0 : index
    %0 = vector.load %arg1[%c0, %c0_0] : memref<256x30xf32, #tpu.memory_space<vmem>>, vector<256x30xf32>
    %c0_1 = arith.constant 0 : index
    %c0_2 = arith.constant 0 : index
    %c0_3 = arith.constant 0 : index
    %1 = vector.load %arg2[%c0_1, %c0_2, %c0_3] : memref<4x64x64xf32, #tpu.memory_space<vmem>>, vector<1x64x64xf32>
    %2 = vector.shape_cast %1 : vector<1x64x64xf32> to vector<64x64xf32>
    %3 = vector.extract_strided_slice %2 {offsets = [0, 0], sizes = [30, 64], strides = [1, 1]} : vector<64x64xf32> to vector<30x64xf32>
    %cst = arith.constant dense<0.000000e+00> : vector<256x64xf32>
    %4 = tpu.matmul %0, %3, %cst {dimension_numbers = #tpu.dot_dimension_numbers<[1], [0], [0], [1], [0, 0, 1, 1], [], []>} : vector<256x30xf32>, vector<30x64xf32>, vector<256x64xf32> -> vector<256x64xf32>
    %c0_4 = arith.constant 0 : index
    %c0_5 = arith.constant 0 : index
    %c0_6 = arith.constant 0 : index
    %5 = vector.load %arg3[%c0_4, %c0_5, %c0_6] : memref<4x1x64xf32, #tpu.memory_space<vmem>>, vector<1x1x64xf32>
    %6 = vector.shape_cast %5 : vector<1x1x64xf32> to vector<1x64xf32>
    %7 = vector.broadcast %6 : vector<1x64xf32> to vector<256x64xf32>
    %8 = arith.addf %4, %7 : vector<256x64xf32>
    %cst_7 = arith.constant 0.000000e+00 : f32
    %9 = vector.broadcast %cst_7 : f32 to vector<256x64xf32>
    %10 = arith.maximumf %8, %9 : vector<256x64xf32>
    %c1 = arith.constant 1 : index
    %c0_8 = arith.constant 0 : index
    %c0_9 = arith.constant 0 : index
    %11 = vector.load %arg2[%c1, %c0_8, %c0_9] : memref<4x64x64xf32, #tpu.memory_space<vmem>>, vector<1x64x64xf32>
    %12 = vector.shape_cast %11 : vector<1x64x64xf32> to vector<64x64xf32>
    %cst_10 = arith.constant dense<0.000000e+00> : vector<256x64xf32>
    %13 = tpu.matmul %10, %12, %cst_10 {dimension_numbers = #tpu.dot_dimension_numbers<[1], [0], [0], [1], [0, 0, 1, 1], [], []>} : vector<256x64xf32>, vector<64x64xf32>, vector<256x64xf32> -> vector<256x64xf32>
    %c1_11 = arith.constant 1 : index
    %c0_12 = arith.constant 0 : index
    %c0_13 = arith.constant 0 : index
    %14 = vector.load %arg3[%c1_11, %c0_12, %c0_13] : memref<4x1x64xf32, #tpu.memory_space<vmem>>, vector<1x1x64xf32>
    %15 = vector.shape_cast %14 : vector<1x1x64xf32> to vector<1x64xf32>
    %16 = vector.broadcast %15 : vector<1x64xf32> to vector<256x64xf32>
    %17 = arith.addf %13, %16 : vector<256x64xf32>
    %cst_14 = arith.constant 0.000000e+00 : f32
    %18 = vector.broadcast %cst_14 : f32 to vector<256x64xf32>
    %19 = arith.maximumf %17, %18 : vector<256x64xf32>
    %c2 = arith.constant 2 : index
    %c0_15 = arith.constant 0 : index
    %c0_16 = arith.constant 0 : index
    %20 = vector.load %arg2[%c2, %c0_15, %c0_16] : memref<4x64x64xf32, #tpu.memory_space<vmem>>, vector<1x64x64xf32>
    %21 = vector.shape_cast %20 : vector<1x64x64xf32> to vector<64x64xf32>
    %cst_17 = arith.constant dense<0.000000e+00> : vector<256x64xf32>
    %22 = tpu.matmul %19, %21, %cst_17 {dimension_numbers = #tpu.dot_dimension_numbers<[1], [0], [0], [1], [0, 0, 1, 1], [], []>} : vector<256x64xf32>, vector<64x64xf32>, vector<256x64xf32> -> vector<256x64xf32>
    %c2_18 = arith.constant 2 : index
    %c0_19 = arith.constant 0 : index
    %c0_20 = arith.constant 0 : index
    %23 = vector.load %arg3[%c2_18, %c0_19, %c0_20] : memref<4x1x64xf32, #tpu.memory_space<vmem>>, vector<1x1x64xf32>
    %24 = vector.shape_cast %23 : vector<1x1x64xf32> to vector<1x64xf32>
    %25 = vector.broadcast %24 : vector<1x64xf32> to vector<256x64xf32>
    %26 = arith.addf %22, %25 : vector<256x64xf32>
    %cst_21 = arith.constant 0.000000e+00 : f32
    %27 = vector.broadcast %cst_21 : f32 to vector<256x64xf32>
    %28 = arith.maximumf %26, %27 : vector<256x64xf32>
    %c3 = arith.constant 3 : index
    %c0_22 = arith.constant 0 : index
    %c0_23 = arith.constant 0 : index
    %29 = vector.load %arg2[%c3, %c0_22, %c0_23] : memref<4x64x64xf32, #tpu.memory_space<vmem>>, vector<1x64x64xf32>
    %30 = vector.shape_cast %29 : vector<1x64x64xf32> to vector<64x64xf32>
    %31 = vector.extract_strided_slice %30 {offsets = [0, 0], sizes = [1, 64], strides = [1, 1]} : vector<64x64xf32> to vector<1x64xf32>
    %c3_24 = arith.constant 3 : index
    %c0_25 = arith.constant 0 : index
    %c0_26 = arith.constant 0 : index
    %32 = vector.load %arg3[%c3_24, %c0_25, %c0_26] : memref<4x1x64xf32, #tpu.memory_space<vmem>>, vector<1x1x64xf32>
    %33 = vector.shape_cast %32 : vector<1x1x64xf32> to vector<1x64xf32>
    %34 = vector.extract_strided_slice %33 {offsets = [0, 0], sizes = [1, 1], strides = [1, 1]} : vector<1x64xf32> to vector<1x1xf32>
    %35 = vector.broadcast %31 : vector<1x64xf32> to vector<256x64xf32>
    %36 = arith.mulf %28, %35 : vector<256x64xf32>
    %cst_27 = arith.constant dense<0.000000e+00> : vector<256xf32>
    %37 = vector.multi_reduction <add>, %36, %cst_27 [1] : vector<256x64xf32> to vector<256xf32>
    %38 = vector.shape_cast %37 : vector<256xf32> to vector<256x1xf32>
    %39 = vector.broadcast %34 : vector<1x1xf32> to vector<256x1xf32>
    %40 = arith.addf %38, %39 : vector<256x1xf32>
    %41 = math.absf %40 : vector<256x1xf32>
    %cst_28 = arith.constant 0.000000e+00 : f32
    %42 = vector.broadcast %cst_28 : f32 to vector<256x1xf32>
    %43 = arith.subf %42, %41 : vector<256x1xf32>
    %44 = math.exp %43 : vector<256x1xf32>
    %cst_29 = arith.constant 1.000000e+00 : f32
    %45 = vector.broadcast %cst_29 : f32 to vector<256x1xf32>
    %46 = arith.addf %45, %44 : vector<256x1xf32>
    %cst_30 = arith.constant 1.000000e+00 : f32
    %47 = vector.broadcast %cst_30 : f32 to vector<256x1xf32>
    %48 = arith.divf %47, %46 : vector<256x1xf32>
    %cst_31 = arith.constant 0.000000e+00 : f32
    %49 = vector.broadcast %cst_31 : f32 to vector<256x1xf32>
    %50 = arith.cmpf oge, %40, %49 : vector<256x1xf32>
    %cst_32 = arith.constant 1.000000e+00 : f32
    %51 = vector.broadcast %cst_32 : f32 to vector<256x1xf32>
    %52 = arith.subf %51, %48 : vector<256x1xf32>
    %53 = arith.select %50, %48, %52 : vector<256x1xi1>, vector<256x1xf32>
    %c0_33 = arith.constant 0 : index
    %c0_34 = arith.constant 0 : index
    %54 = vector.load %arg4[%c0_33, %c0_34] : memref<256x1xf32, #tpu.memory_space<vmem>>, vector<256x1xf32>
    tpu.vector_store %arg4[%c0_33, %c0_34], %53 {strides = array<i32>} : memref<256x1xf32, #tpu.memory_space<vmem>>, vector<256x1xf32>,
    return
  }
  func.func @transform_0(%arg0: i32) -> (i32, i32) {
    %c0_i32 = arith.constant 0 : i32
    %c0_i32_0 = arith.constant 0 : i32
    return %arg0, %c0_i32 : i32, i32
  }
  func.func @transform_1(%arg0: i32) -> (i32, i32, i32) {
    %c0_i32 = arith.constant 0 : i32
    %c0_i32_0 = arith.constant 0 : i32
    %c0_i32_1 = arith.constant 0 : i32
    %c0_i32_2 = arith.constant 0 : i32
    return %c0_i32, %c0_i32_0, %c0_i32_1 : i32, i32, i32
  }
  func.func @transform_2(%arg0: i32) -> (i32, i32, i32) {
    %c0_i32 = arith.constant 0 : i32
    %c0_i32_0 = arith.constant 0 : i32
    %c0_i32_1 = arith.constant 0 : i32
    %c0_i32_2 = arith.constant 0 : i32
    return %c0_i32, %c0_i32_0, %c0_i32_1 : i32, i32, i32
  }
  func.func @transform_3(%arg0: i32) -> (i32, i32) {
    %c0_i32 = arith.constant 0 : i32
    %c0_i32_0 = arith.constant 0 : i32
    return %arg0, %c0_i32 : i32, i32
  }
}

</mosaic_0001>

<bundles_post_ra>
// kernel: tpu_custom_call.1
= control target key start
LH: loop header
LB: loop body
LE: loop exit
PB: predicated region body
PF: predicated region fallthrough
CT: control target
= control target key end

     0   :  { %s2282_s12 = smov 0   ;;  %s2995_s0 = inlined_call_operand.vmem [shape: f32[768,30], index: 0, kind: input, shape index: {}]   ;;  %s2996_s1 = inlined_call_operand.vmem [shape: f32[4,64,64], index: 1, kind: input, shape index: {}]   ;;  %s2997_s2 = inlined_call_operand.vmem [shape: f32[4,1,64], index: 2, kind: input, shape index: {}]   ;;  %s2998_s3 = inlined_call_operand.vmem [shape: f32[768,1], index: 3, kind: output, shape index: {}]  }
   0x1 LB: > { %s1964_s13 = sadd.s32 4294967295, %s2260_s12   ;;  %p1968_p0 = scmp.ge.s32.totalorder %s2260_s12, 1  ;;  %s2260_s12 = sphi %s2282_s12, %s13_s12  }
   0x2   : > { %p138_p1 = scmp.lt.s32.totalorder %s2260_s12, 4 }
   0x4   : > { %p139_p2 = pnand %p1968_p0, %p138_p1 }
   0x5   : > { %s1969_s18 = sshll.u32 (!%p139_p2), %s1964_s13, 5 }
   0x6   : > { %142 = sbr.rel (%p139_p2) target bundleno = 826 (0x33a), region = 32  ;;  %p163_p3 = scmp.lt.s32.totalorder (!%p139_p2), %s1969_s18, 95 }
   0xb   : > { %v209_v0 = vld [vmem:[%s2996_s1 + $0x18] sm:$0xff]  ;;  %vm311_vm0 = vcmask 1045504   ;;  %v208_v1 = vld [vmem:[%s2996_s1 + $0x10] sm:$0xff]  ;;  %v207_v2 = vld [vmem:[%s2996_s1 + $0x8] sm:$0xff]  ;;  %s3000_s18 = smov (!%p163_p3, %s1969_s18), 95  ;;  %vm214_vm1 = vcmask 244736  }
   0xc   : > { %1973 = vmatpush.msk.msra.mxu0 %vm311_vm0, %v209_v0  ;;  %2092 = vmatpush.msk.msra.mxu3 %vm311_vm0, %v209_v0  ;;  %v206_v3 = vld [vmem:[%s2996_s1] sm:$0xff]  ;;  %s1970_s23 = sshll.u32 %s3000_s18, 3  ;;  %v2013_v15 = vld [vmem:[%s2996_s1 + $0x78] sm:$0xff]  ;;  %v2012_v16 = vld [vmem:[%s2996_s1 + $0x70] sm:$0xff]  ;;  %vm474_vm2 = vcmask 523264   ;;  %vm1875_vm7 = vcmask 7168  }
   0xd   : > { %s2310_s26 = scalar_lea.vmem %s2995_s0, %s1970_s23  ;;  %579 = vmatpush.msra.mxu1 %v2013_v15  ;;  %v2011_v17 = vld [vmem:[%s2996_s1 + $0x68] sm:$0xff]  ;;  %v2010_v19 = vld [vmem:[%s2996_s1 + $0x60] sm:$0xff]  ;;  %v2009_v20 = vld [vmem:[%s2996_s1 + $0x58] sm:$0xff]  ;;  %s2663_s22 = scalar_lea.vmem %s2998_s3, %s1970_s23 }
   0xe   : > { %328 = vmatpush.msra.mxu0 %v208_v1  ;;  %2093 = vmatpush.msra.mxu3 %v208_v1  ;;  %v174_v4 = vld [vmem:[%s2310_s26] sm:$0xff]  ;;  %v175_v5 = vld [vmem:[%s2310_s26 + $0x8] sm:$0xff]  ;;  %v176_v6 = vld [vmem:[%s2310_s26 + $0x10] sm:$0xff] }
   0xf   : > { %v177_v7 = vld [vmem:[%s2310_s26 + $0x18] sm:$0xff]  ;;  %v178_v8 = vld [vmem:[%s2310_s26 + $0x20] sm:$0xff]  ;;  %v179_v9 = vld [vmem:[%s2310_s26 + $0x28] sm:$0xff]  ;;  %580 = vmatpush.msra.mxu1 %v2012_v16 }
  0x10   : > { %329 = vmatpush.msra.mxu0 %v207_v2  ;;  %2094 = vmatpush.msra.mxu3 %v207_v2  ;;  %v180_v10 = vld [vmem:[%s2310_s26 + $0x30] sm:$0xff]  ;;  %v181_v11 = vld [vmem:[%s2310_s26 + $0x38] sm:$0xff]  ;;  %v182_v12 = vld [vmem:[%s2310_s26 + $0x40] sm:$0xff] }
  0x11   : > { %v183_v13 = vld [vmem:[%s2310_s26 + $0x48] sm:$0xff]  ;;  %v184_v14 = vld [vmem:[%s2310_s26 + $0x50] sm:$0xff]  ;;  %v185_v18 = vld [vmem:[%s2310_s26 + $0x58] sm:$0xff]  ;;  %581 = vmatpush.msra.mxu1 %v2011_v17 }
  0x12   : > { %330 = vmatpush.msra.mxu0 %v206_v3  ;;  %2095 = vmatpush.msra.mxu3 %v206_v3  ;;  %v2008_v21 = vld [vmem:[%s2996_s1 + $0x50] sm:$0xff]  ;;  %v186_v22 = vld [vmem:[%s2310_s26 + $0x60] sm:$0xff]  ;;  %v2007_v23 = vld [vmem:[%s2996_s1 + $0x48] sm:$0xff] }
  0x13   : > { %1974 = vmatmul.msk.f32.vlgmr.msra.gmra.mxu0 %vm214_vm1, %v174_v4  ;;  %582 = vmatpush.msra.mxu1 %v2010_v19  ;;  %v2006_v24 = vld [vmem:[%s2996_s1 + $0x40] sm:$0xff]  ;;  %v187_v25 = vld [vmem:[%s2310_s26 + $0x68] sm:$0xff]  ;;  %v188_v26 = vld [vmem:[%s2310_s26 + $0x70] sm:$0xff] }
  0x14   : > { %2096 = vmatpush.msrb.mxu3 %v2013_v15  ;;  %v189_v27 = vld [vmem:[%s2310_s26 + $0x78] sm:$0xff]  ;;  %v2371_v28 = vld [vmem:[%s2997_s2] ss:$0 sm:$0xff]  ;;  %v191_v34 = vld [vmem:[%s2310_s26 + $0x88] sm:$0xff] }
  0x15   : > { %583 = vmatpush.msra.mxu1 %v2009_v20  ;;  %v190_v30 = vld [vmem:[%s2310_s26 + $0x80] sm:$0xff]  ;;  %v192_v38 = vld [vmem:[%s2310_s26 + $0x90] sm:$0xff]  ;;  %v193_v42 = vld [vmem:[%s2310_s26 + $0x98] sm:$0xff] }
  0x16   : > { %2097 = vmatpush.msrb.mxu3 %v2012_v16  ;;  %v194_v46 = vld [vmem:[%s2310_s26 + $0xa0] sm:$0xff]  ;;  %v199_v49 = vld [vmem:[%s2310_s26 + $0xc8] sm:$0xff]  ;;  %v200_v54 = vld [vmem:[%s2310_s26 + $0xd0] sm:$0xff] }
  0x17   : > { %584 = vmatpush.msra.mxu1 %v2008_v21  ;;  %1999 = vmatmul.msk.f32.vlgmr.msra.gmra.mxu3 %vm214_vm1, %v199_v49  ;;  %v195_v51 = vld [vmem:[%s2310_s26 + $0xa8] sm:$0xff]  ;;  %v196_v56 = vld [vmem:[%s2310_s26 + $0xb0] sm:$0xff]  ;;  %v201_v59 = vld [vmem:[%s2310_s26 + $0xd8] sm:$0xff] }
  0x18   : > { %2098 = vmatpush.msrb.mxu3 %v2011_v17  ;;  %v197_v61 = vld [vmem:[%s2310_s26 + $0xb8] sm:$0xff]  ;;  %v202_v0 = vld [vmem:[%s2310_s26 + $0xe0] sm:$0xff]  ;;  %v2053_v17 = vld [vmem:[%s2996_s1 + $0xb0] sm:$0xff] }
  0x19   : > { %585 = vmatpush.msra.mxu1 %v2007_v23  ;;  %v198_v2 = vld [vmem:[%s2310_s26 + $0xc0] sm:$0xff] }
  0x1a   : > { %2099 = vmatpush.msrb.mxu3 %v2010_v19  ;;  %v2052_v19 = vld [vmem:[%s2996_s1 + $0xa8] sm:$0xff] }
  0x1b   : > { %1975 = vmatmul.msk.f32.gmra.mxu0 %vm214_vm1, %v175_v5  ;;  %586 = vmatpush.msra.mxu1 %v2006_v24  ;;  %v203_v5 = vld [vmem:[%s2310_s26 + $0xe8] sm:$0xff] }
  0x1c   : > { %2100 = vmatpush.msrb.mxu3 %v2009_v20  ;;  %v2051_v20 = vld [vmem:[%s2996_s1 + $0xa0] sm:$0xff] }
  0x1e   : > { %2101 = vmatpush.msrb.mxu3 %v2008_v21  ;;  %v2050_v21 = vld [vmem:[%s2996_s1 + $0x98] sm:$0xff] }
  0x1f   : > { %2000 = vmatmul.msk.f32.gmra.mxu3 %vm214_vm1, %v200_v54 }
  0x20   : > { %2102 = vmatpush.msrb.mxu3 %v2007_v23 }
  0x22   : > { %2103 = vmatpush.msrb.mxu3 %v2006_v24  ;;  %v2049_v24 = vld [vmem:[%s2996_s1 + $0x90] sm:$0xff] }
  0x23   : > { %1976 = vmatmul.msk.f32.gmra.mxu0 %vm214_vm1, %v176_v6 }
  0x27   : > { %2001 = vmatmul.msk.f32.gmra.mxu3 %vm214_vm1, %v201_v59 }
  0x2b   : > { %1977 = vmatmul.msk.f32.gmra.mxu0 %vm214_vm1, %v177_v7 }
  0x2f   : > { %2002 = vmatmul.msk.f32.gmra.mxu3 %vm214_vm1, %v202_v0 }
  0x33   : > { %1978 = vmatmul.msk.f32.gmra.mxu0 %vm214_vm1, %v178_v8 }
  0x37   : > { %2003 = vmatmul.msk.f32.gmra.mxu3 %vm214_vm1, %v203_v5 }
  0x3b   : > { %1979 = vmatmul.msk.f32.gmra.mxu0 %vm214_vm1, %v179_v9  ;;  %v204_v9 = vld [vmem:[%s2310_s26 + $0xf0] sm:$0xff] }
  0x3f   : > { %2004 = vmatmul.msk.f32.gmra.mxu3 %vm214_vm1, %v204_v9 }
  0x43   : > { %1980 = vmatmul.msk.f32.gmra.mxu0 %vm214_vm1, %v180_v10 }
  0x4b   : > { %1981 = vmatmul.msk.f32.gmra.mxu0 %vm214_vm1, %v181_v11 }
  0x53   : > { %1982 = vmatmul.msk.f32.gmra.mxu0 %vm214_vm1, %v182_v12 }
  0x5b   : > { %1983 = vmatmul.msk.f32.gmra.mxu0 %vm214_vm1, %v183_v13  ;;  %v205_v13 = vld [vmem:[%s2310_s26 + $0xf8] sm:$0xff] }
  0x5c   : > { %2005 = vmatmul.msk.f32.gmra.mxu3 %vm214_vm1, %v205_v13 }
  0x63   : > { %1984 = vmatmul.msk.f32.gmra.mxu0 %vm214_vm1, %v184_v14  ;;  %v2054_v14 = vld [vmem:[%s2996_s1 + $0xb8] sm:$0xff] }
  0x64   : > { %834 = vmatpush.msra.mxu2 %v2054_v14  ;;  %2104 = vmatpush.msra.mxu3 %v2054_v14 }
  0x66   : > { %835 = vmatpush.msra.mxu2 %v2053_v17  ;;  %2105 = vmatpush.msra.mxu3 %v2053_v17 }
  0x68   : > { %836 = vmatpush.msra.mxu2 %v2052_v19  ;;  %2106 = vmatpush.msra.mxu3 %v2052_v19 }
  0x6a   : > { %837 = vmatpush.msra.mxu2 %v2051_v20  ;;  %2107 = vmatpush.msra.mxu3 %v2051_v20 }
  0x6b   : > { %1985 = vmatmul.msk.f32.gmra.mxu0 %vm214_vm1, %v185_v18 }
  0x6c   : > { %838 = vmatpush.msra.mxu2 %v2050_v21  ;;  %2108 = vmatpush.msra.mxu3 %v2050_v21 }
  0x6e   : > { %839 = vmatpush.msra.mxu2 %v2049_v24  ;;  %2109 = vmatpush.msra.mxu3 %v2049_v24 }
  0x73   : > { %1986 = vmatmul.msk.f32.gmra.mxu0 %vm214_vm1, %v186_v22 }
  0x7b   : > { %1987 = vmatmul.msk.f32.gmra.mxu0 %vm214_vm1, %v187_v25 }
  0x83   : > { %1988 = vmatmul.msk.f32.gmra.mxu0 %vm214_vm1, %v188_v26  ;;  %v2048_v26 = vld [vmem:[%s2996_s1 + $0x88] sm:$0xff] }
  0x84   : > { %840 = vmatpush.msra.mxu2 %v2048_v26  ;;  %2110 = vmatpush.msra.mxu3 %v2048_v26 }
  0x8b   : > { %1989 = vmatmul.msk.f32.gmra.mxu0 %vm214_vm1, %v189_v27  ;;  %v2047_v27 = vld [vmem:[%s2996_s1 + $0x80] sm:$0xff] }
  0x8c   : > { %841 = vmatpush.msra.mxu2 %v2047_v27  ;;  %2111 = vmatpush.msra.mxu3 %v2047_v27 }
  0x90   : > { %v332_v29 = vpop.f32.mrf.mxu0 }
  0x91   : > { %v333_v31 = vadd.f32 %v2371_v28, %v332_v29 }
  0x93   : > { %v428_v32 = vmax.f32 %v333_v31, 0.0  ;;  %1990 = vmatmul.msk.f32.gmra.mxu0 %vm214_vm1, %v190_v30 }
  0x95   : > { %2015 = vmatmul.msk.f32.vlgmr.msra.gmra.mxu1 %vm474_vm2, %v428_v32 }
  0x98   : > { %v335_v33 = vpop.f32.mrf.mxu0 }
  0x99   : > { %v336_v35 = vadd.f32 %v2371_v28, %v335_v33 }
  0x9a   : > { %v407_v17 = vpop.f32.mrf.mxu3 }
  0x9b   : > { %v429_v36 = vmax.f32 %v336_v35, 0.0  ;;  %1991 = vmatmul.msk.f32.gmra.mxu0 %vm214_vm1, %v191_v34 }
  0x9d   : > { %2016 = vmatmul.msk.f32.gmra.mxu1 %vm474_vm2, %v429_v36 }
  0xa0   : > { %v338_v37 = vpop.f32.mrf.mxu0 }
  0xa1   : > { %v339_v39 = vadd.f32 %v2371_v28, %v338_v37 }
  0xa3   : > { %v430_v40 = vmax.f32 %v339_v39, 0.0  ;;  %1992 = vmatmul.msk.f32.gmra.mxu0 %vm214_vm1, %v192_v38  ;;  %v2464_v38 = vld [vmem:[%s2997_s2 + $0x1] ss:$0 sm:$0xff] }
  0xa5   : > { %2017 = vmatmul.msk.f32.gmra.mxu1 %vm474_vm2, %v430_v40 }
  0xa8   : > { %v341_v41 = vpop.f32.mrf.mxu0 }
  0xa9   : > { %v342_v43 = vadd.f32 %v2371_v28, %v341_v41 }
  0xab   : > { %v431_v44 = vmax.f32 %v342_v43, 0.0  ;;  %1993 = vmatmul.msk.f32.gmra.mxu0 %vm214_vm1, %v193_v42 }
  0xad   : > { %2018 = vmatmul.msk.f32.gmra.mxu1 %vm474_vm2, %v431_v44 }
  0xb0   : > { %v344_v45 = vpop.f32.mrf.mxu0 }
  0xb1   : > { %v345_v47 = vadd.f32 %v2371_v28, %v344_v45 }
  0xb3   : > { %v432_v48 = vmax.f32 %v345_v47, 0.0  ;;  %1994 = vmatmul.msk.f32.gmra.mxu0 %vm214_vm1, %v194_v46 }
  0xb5   : > { %2019 = vmatmul.msk.f32.gmra.mxu1 %vm474_vm2, %v432_v48 }
  0xb8   : > { %v347_v50 = vpop.f32.mrf.mxu0 }
  0xb9   : > { %v348_v52 = vadd.f32 %v2371_v28, %v347_v50 }
  0xbb   : > { %v433_v53 = vmax.f32 %v348_v52, 0.0  ;;  %1995 = vmatmul.msk.f32.gmra.mxu0 %vm214_vm1, %v195_v51 }
  0xbd   : > { %2020 = vmatmul.msk.f32.gmra.mxu1 %vm474_vm2, %v433_v53 }
  0xc0   : > { %v350_v55 = vpop.f32.mrf.mxu0 }
  0xc1   : > { %v351_v57 = vadd.f32 %v2371_v28, %v350_v55 }
  0xc3   : > { %v434_v58 = vmax.f32 %v351_v57, 0.0  ;;  %1996 = vmatmul.msk.f32.gmra.mxu0 %vm214_vm1, %v196_v56 }
  0xc5   : > { %2021 = vmatmul.msk.f32.gmra.mxu1 %vm474_vm2, %v434_v58 }
  0xc8   : > { %v353_v60 = vpop.f32.mrf.mxu0 }
  0xc9   : > { %v354_v62 = vadd.f32 %v2371_v28, %v353_v60 }
  0xcb   : > { %v435_v63 = vmax.f32 %v354_v62, 0.0  ;;  %1997 = vmatmul.msk.f32.gmra.mxu0 %vm214_vm1, %v197_v61 }
  0xcd   : > { %2022 = vmatmul.msk.f32.gmra.mxu1 %vm474_vm2, %v435_v63 }
  0xd0   : > { %v356_v1 = vpop.f32.mrf.mxu0 }
  0xd1   : > { %v357_v3 = vadd.f32 %v2371_v28, %v356_v1 }
  0xd3   : > { %v436_v4 = vmax.f32 %v357_v3, 0.0  ;;  %1998 = vmatmul.msk.f32.gmra.mxu0 %vm214_vm1, %v198_v2 }
  0xd5   : > { %2023 = vmatmul.msk.f32.gmra.mxu1 %vm474_vm2, %v436_v4 }
  0xd8   : > { %v359_v6 = vpop.f32.mrf.mxu0 }
  0xd9   : > { %v360_v7 = vadd.f32 %v2371_v28, %v359_v6 }
  0xdb   : > { %v437_v8 = vmax.f32 %v360_v7, 0.0 }
  0xdd   : > { %2024 = vmatmul.msk.f32.gmra.mxu1 %vm474_vm2, %v437_v8 }
  0xe0   : > { %v362_v10 = vpop.f32.mrf.mxu0 }
  0xe1   : > { %v363_v11 = vadd.f32 %v2371_v28, %v362_v10 }
  0xe3   : > { %v438_v12 = vmax.f32 %v363_v11, 0.0 }
  0xe5   : > { %2025 = vmatmul.msk.f32.gmra.mxu1 %vm474_vm2, %v438_v12 }
  0xe8   : > { %v365_v15 = vpop.f32.mrf.mxu0 }
  0xe9   : > { %v366_v16 = vadd.f32 %v2371_v28, %v365_v15 }
  0xeb   : > { %v439_v18 = vmax.f32 %v366_v16, 0.0 }
  0xed   : > { %2026 = vmatmul.msk.f32.gmra.mxu1 %vm474_vm2, %v439_v18 }
  0xf0   : > { %v368_v22 = vpop.f32.mrf.mxu0 }
  0xf1   : > { %v369_v23 = vadd.f32 %v2371_v28, %v368_v22 }
  0xf3   : > { %v440_v25 = vmax.f32 %v369_v23, 0.0 }
  0xf5   : > { %2027 = vmatmul.msk.f32.gmra.mxu1 %vm474_vm2, %v440_v25  ;;  %v410_v25 = vpop.f32.mrf.mxu3 }
  0xf8   : > { %v371_v29 = vpop.f32.mrf.mxu0 }
  0xf9   : > { %v372_v30 = vadd.f32 %v2371_v28, %v371_v29 }
  0xfb   : > { %v441_v31 = vmax.f32 %v372_v30, 0.0 }
  0xfd   : > { %2028 = vmatmul.msk.f32.gmra.mxu1 %vm474_vm2, %v441_v31 }
 0x100   : > { %v374_v32 = vpop.f32.mrf.mxu0 }
 0x101   : > { %v375_v33 = vadd.f32 %v2371_v28, %v374_v32  ;;  %v408_v32 = vadd.f32 %v2371_v28, %v407_v17 }
 0x103   : > { %v442_v34 = vmax.f32 %v375_v33, 0.0  ;;  %v453_v33 = vmax.f32 %v408_v32, 0.0 }
 0x105   : > { %2029 = vmatmul.msk.f32.gmra.mxu1 %vm474_vm2, %v442_v34 }
 0x108   : > { %v377_v35 = vpop.f32.mrf.mxu0 }
 0x109   : > { %v378_v36 = vadd.f32 %v2371_v28, %v377_v35  ;;  %v413_v35 = vpop.f32.mrf.mxu3 }
 0x10b   : > { %v443_v37 = vmax.f32 %v378_v36, 0.0 }
 0x10d   : > { %2030 = vmatmul.msk.f32.gmra.mxu1 %vm474_vm2, %v443_v37 }
 0x110   : > { %v380_v39 = vpop.f32.mrf.mxu0 }
 0x111   : > { %v381_v40 = vadd.f32 %v2371_v28, %v380_v39  ;;  %v411_v39 = vadd.f32 %v2371_v28, %v410_v25 }
 0x112   : > { %v588_v41 = vpop.f32.mrf.mxu1 }
 0x113   : > { %v444_v42 = vmax.f32 %v381_v40, 0.0  ;;  %v589_v43 = vadd.f32 %v2464_v38, %v588_v41  ;;  %v454_v40 = vmax.f32 %v411_v39, 0.0 }
 0x115   : > { %v684_v44 = vmax.f32 %v589_v43, 0.0  ;;  %2031 = vmatmul.msk.f32.gmra.mxu1 %vm474_vm2, %v444_v42  ;;  %v416_v43 = vpop.f32.mrf.mxu3 }
 0x117   : > { %2056 = vmatmul.msk.f32.vlgmr.msra.gmra.mxu2 %vm474_vm2, %v684_v44 }
 0x118   : > { %v383_v45 = vpop.f32.mrf.mxu0 }
 0x119   : > { %v384_v46 = vadd.f32 %v2371_v28, %v383_v45  ;;  %v414_v45 = vadd.f32 %v2371_v28, %v413_v35 }
 0x11a   : > { %v591_v47 = vpop.f32.mrf.mxu1 }
 0x11b   : > { %v445_v48 = vmax.f32 %v384_v46, 0.0  ;;  %v592_v49 = vadd.f32 %v2464_v38, %v591_v47  ;;  %v455_v46 = vmax.f32 %v414_v45, 0.0 }
 0x11d   : > { %v685_v50 = vmax.f32 %v592_v49, 0.0  ;;  %2032 = vmatmul.msk.f32.gmra.mxu1 %vm474_vm2, %v445_v48 }
 0x11f   : > { %2057 = vmatmul.msk.f32.gmra.mxu2 %vm474_vm2, %v685_v50  ;;  %v417_v50 = vadd.f32 %v2371_v28, %v416_v43 }
 0x120   : > { %v386_v51 = vpop.f32.mrf.mxu0 }
 0x121   : > { %v387_v52 = vadd.f32 %v2371_v28, %v386_v51  ;;  %v419_v51 = vpop.f32.mrf.mxu3 }
 0x122   : > { %v594_v53 = vpop.f32.mrf.mxu1 }
 0x123   : > { %v446_v54 = vmax.f32 %v387_v52, 0.0  ;;  %v595_v55 = vadd.f32 %v2464_v38, %v594_v53  ;;  %v456_v52 = vmax.f32 %v417_v50, 0.0 }
 0x125   : > { %v686_v56 = vmax.f32 %v595_v55, 0.0  ;;  %2033 = vmatmul.msk.f32.gmra.mxu1 %vm474_vm2, %v446_v54 }
 0x127   : > { %2058 = vmatmul.msk.f32.gmra.mxu2 %vm474_vm2, %v686_v56  ;;  %v420_v56 = vadd.f32 %v2371_v28, %v419_v51 }
 0x128   : > { %v389_v57 = vpop.f32.mrf.mxu0 }
 0x129   : > { %v390_v58 = vadd.f32 %v2371_v28, %v389_v57  ;;  %v422_v57 = vpop.f32.mrf.mxu3 }
 0x12a   : > { %v597_v59 = vpop.f32.mrf.mxu1 }
 0x12b   : > { %v447_v60 = vmax.f32 %v390_v58, 0.0  ;;  %v598_v61 = vadd.f32 %v2464_v38, %v597_v59  ;;  %v457_v58 = vmax.f32 %v420_v56, 0.0 }
 0x12d   : > { %v687_v62 = vmax.f32 %v598_v61, 0.0  ;;  %2034 = vmatmul.msk.f32.gmra.mxu1 %vm474_vm2, %v447_v60 }
 0x12f   : > { %2059 = vmatmul.msk.f32.gmra.mxu2 %vm474_vm2, %v687_v62  ;;  %v423_v62 = vadd.f32 %v2371_v28, %v422_v57 }
 0x130   : > { %v392_v63 = vpop.f32.mrf.mxu0 }
 0x131   : > { %v393_v0 = vadd.f32 %v2371_v28, %v392_v63  ;;  %v458_v63 = vmax.f32 %v423_v62, 0.0 }
 0x132   : > { %v600_v1 = vpop.f32.mrf.mxu1 }
 0x133   : > { %v448_v2 = vmax.f32 %v393_v0, 0.0  ;;  %v601_v3 = vadd.f32 %v2464_v38, %v600_v1  ;;  %v425_v1 = vpop.f32.mrf.mxu3 }
 0x135   : > { %v688_v4 = vmax.f32 %v601_v3, 0.0  ;;  %2035 = vmatmul.msk.f32.gmra.mxu1 %vm474_vm2, %v448_v2 }
 0x137   : > { %2060 = vmatmul.msk.f32.gmra.mxu2 %vm474_vm2, %v688_v4  ;;  %v426_v4 = vadd.f32 %v2371_v28, %v425_v1 }
 0x138   : > { %v395_v5 = vpop.f32.mrf.mxu0 }
 0x139   : > { %v396_v6 = vadd.f32 %v2371_v28, %v395_v5  ;;  %v459_v5 = vmax.f32 %v426_v4, 0.0 }
 0x13a   : > { %v603_v7 = vpop.f32.mrf.mxu1 }
 0x13b   : > { %v449_v8 = vmax.f32 %v396_v6, 0.0  ;;  %v604_v9 = vadd.f32 %v2464_v38, %v603_v7 }
 0x13d   : > { %v689_v10 = vmax.f32 %v604_v9, 0.0  ;;  %2036 = vmatmul.msk.f32.gmra.mxu1 %vm474_vm2, %v449_v8 }
 0x13f   : > { %2061 = vmatmul.msk.f32.gmra.mxu2 %vm474_vm2, %v689_v10 }
 0x140   : > { %v398_v11 = vpop.f32.mrf.mxu0 }
 0x141   : > { %v399_v12 = vadd.f32 %v2371_v28, %v398_v11 }
 0x142   : > { %v606_v13 = vpop.f32.mrf.mxu1 }
 0x143   : > { %v450_v14 = vmax.f32 %v399_v12, 0.0  ;;  %v607_v15 = vadd.f32 %v2464_v38, %v606_v13  ;;  %v2088_v12 = vld [vmem:[%s2996_s1 + $0xc0] sm:$0xff] }
 0x144   : > { %v2542_v17 = vperm.slane %v2088_v12, 0 }
 0x145   : > { %v690_v16 = vmax.f32 %v607_v15, 0.0  ;;  %2037 = vmatmul.msk.f32.gmra.mxu1 %vm474_vm2, %v450_v14 }
 0x147   : > { %2062 = vmatmul.msk.f32.gmra.mxu2 %vm474_vm2, %v690_v16 }
 0x148   : > { %v401_v18 = vpop.f32.mrf.mxu0 }
 0x149   : > { %v402_v19 = vadd.f32 %v2371_v28, %v401_v18 }
 0x14a   : > { %v609_v20 = vpop.f32.mrf.mxu1 }
 0x14b   : > { %v451_v21 = vmax.f32 %v402_v19, 0.0  ;;  %v610_v22 = vadd.f32 %v2464_v38, %v609_v20 }
 0x14d   : > { %v691_v23 = vmax.f32 %v610_v22, 0.0  ;;  %2038 = vmatmul.msk.f32.gmra.mxu1 %vm474_vm2, %v451_v21 }
 0x14f   : > { %2063 = vmatmul.msk.f32.gmra.mxu2 %vm474_vm2, %v691_v23 }
 0x150   : > { %v404_v24 = vpop.f32.mrf.mxu0 }
 0x151   : > { %v405_v26 = vadd.f32 %v2371_v28, %v404_v24  ;;  %v2535_v28 = vld [vmem:[%s2997_s2 + $0x2] ss:$0 sm:$0xff] }
 0x152   : > { %v612_v27 = vpop.f32.mrf.mxu1 }
 0x153   : > { %v452_v29 = vmax.f32 %v405_v26, 0.0  ;;  %v613_v30 = vadd.f32 %v2464_v38, %v612_v27 }
 0x155   : > { %v692_v31 = vmax.f32 %v613_v30, 0.0  ;;  %2039 = vmatmul.msk.f32.vlgmr.msrb.gmra.mxu3 %vm474_vm2, %v452_v29 }
 0x157   : > { %2064 = vmatmul.msk.f32.gmra.mxu2 %vm474_vm2, %v692_v31 }
 0x15a   : > { %v615_v34 = vpop.f32.mrf.mxu1 }
 0x15b   : > { %v616_v36 = vadd.f32 %v2464_v38, %v615_v34 }
 0x15d   : > { %v693_v37 = vmax.f32 %v616_v36, 0.0  ;;  %2040 = vmatmul.msk.f32.gmra.mxu3 %vm474_vm2, %v453_v33 }
 0x15f   : > { %2065 = vmatmul.msk.f32.gmra.mxu2 %vm474_vm2, %v693_v37 }
 0x162   : > { %v618_v41 = vpop.f32.mrf.mxu1 }
 0x163   : > { %v619_v42 = vadd.f32 %v2464_v38, %v618_v41 }
 0x165   : > { %v694_v44 = vmax.f32 %v619_v42, 0.0  ;;  %2041 = vmatmul.msk.f32.gmra.mxu3 %vm474_vm2, %v454_v40 }
 0x167   : > { %2066 = vmatmul.msk.f32.gmra.mxu2 %vm474_vm2, %v694_v44 }
 0x16a   : > { %v621_v47 = vpop.f32.mrf.mxu1 }
 0x16b   : > { %v622_v48 = vadd.f32 %v2464_v38, %v621_v47 }
 0x16d   : > { %v695_v49 = vmax.f32 %v622_v48, 0.0  ;;  %2042 = vmatmul.msk.f32.gmra.mxu3 %vm474_vm2, %v455_v46 }
 0x16f   : > { %2067 = vmatmul.msk.f32.gmra.mxu2 %vm474_vm2, %v695_v49 }
 0x172   : > { %v624_v53 = vpop.f32.mrf.mxu1 }
 0x173   : > { %v625_v54 = vadd.f32 %v2464_v38, %v624_v53 }
 0x175   : > { %v696_v55 = vmax.f32 %v625_v54, 0.0  ;;  %2043 = vmatmul.msk.f32.gmra.mxu3 %vm474_vm2, %v456_v52 }
 0x177   : > { %2068 = vmatmul.msk.f32.gmra.mxu2 %vm474_vm2, %v696_v55 }
 0x17a   : > { %v627_v59 = vpop.f32.mrf.mxu1 }
 0x17b   : > { %v628_v60 = vadd.f32 %v2464_v38, %v627_v59 }
 0x17d   : > { %v697_v61 = vmax.f32 %v628_v60, 0.0  ;;  %2044 = vmatmul.msk.f32.gmra.mxu3 %vm474_vm2, %v457_v58 }
 0x17f   : > { %2069 = vmatmul.msk.f32.gmra.mxu2 %vm474_vm2, %v697_v61 }
 0x182   : > { %v630_v0 = vpop.f32.mrf.mxu1 }
 0x183   : > { %v631_v2 = vadd.f32 %v2464_v38, %v630_v0 }
 0x185   : > { %v698_v3 = vmax.f32 %v631_v2, 0.0  ;;  %2045 = vmatmul.msk.f32.gmra.mxu3 %vm474_vm2, %v458_v63 }
 0x187   : > { %2070 = vmatmul.msk.f32.gmra.mxu2 %vm474_vm2, %v698_v3 }
 0x18a   : > { %v633_v6 = vpop.f32.mrf.mxu1 }
 0x18b   : > { %v634_v7 = vadd.f32 %v2464_v38, %v633_v6 }
 0x18d   : > { %v699_v8 = vmax.f32 %v634_v7, 0.0  ;;  %2046 = vmatmul.msk.f32.gmra.mxu3 %vm474_vm2, %v459_v5 }
 0x18f   : > { %2071 = vmatmul.msk.f32.gmra.mxu2 %vm474_vm2, %v699_v8 }
 0x192   : > { %v636_v9 = vpop.f32.mrf.mxu1 }
 0x193   : > { %v637_v10 = vadd.f32 %v2464_v38, %v636_v9 }
 0x195   : > { %v700_v11 = vmax.f32 %v637_v10, 0.0 }
 0x197   : > { %2072 = vmatmul.msk.f32.gmra.mxu2 %vm474_vm2, %v700_v11 }
 0x19a   : > { %v639_v13 = vpop.f32.mrf.mxu1  ;;  %v843_v14 = vpop.f32.mrf.mxu2 }
 0x19b   : > { %v640_v15 = vadd.f32 %v2464_v38, %v639_v13  ;;  %v844_v16 = vadd.f32 %v2535_v28, %v843_v14 }
 0x19d   : > { %v701_v18 = vmax.f32 %v640_v15, 0.0  ;;  %v939_v19 = vmax.f32 %v844_v16, 0.0 }
 0x19f   : > { %2073 = vmatmul.msk.f32.gmra.mxu2 %vm474_vm2, %v701_v18  ;;  %v976_v20 = vmul.f32 %v2542_v17, %v939_v19 }
 0x1a1   : > { %v1008_v21 = vsel %vm474_vm2, %v976_v20, 0.0 }
 0x1a2   : > { %v642_v22 = vpop.f32.mrf.mxu1  ;;  %v846_v23 = vpop.f32.mrf.mxu2  ;;  %1009 = vadd.xlane.f32.xlu0 %v1008_v21 }
 0x1a3   : > { %v643_v24 = vadd.f32 %v2464_v38, %v642_v22  ;;  %v847_v25 = vadd.f32 %v2535_v28, %v846_v23 }
 0x1a5   : > { %v702_v26 = vmax.f32 %v643_v24, 0.0  ;;  %v940_v27 = vmax.f32 %v847_v25, 0.0 }
 0x1a7   : > { %2074 = vmatmul.msk.f32.gmra.mxu2 %vm474_vm2, %v702_v26  ;;  %v977_v29 = vmul.f32 %v2542_v17, %v940_v27 }
 0x1a9   : > { %v1011_v30 = vsel %vm474_vm2, %v977_v29, 0.0 }
 0x1aa   : > { %v645_v31 = vpop.f32.mrf.mxu1  ;;  %v849_v32 = vpop.f32.mrf.mxu2  ;;  %1012 = vadd.xlane.f32.xlu0 %v1011_v30 }
 0x1ab   : > { %v646_v33 = vadd.f32 %v2464_v38, %v645_v31  ;;  %v850_v34 = vadd.f32 %v2535_v28, %v849_v32 }
 0x1ad   : > { %v703_v35 = vmax.f32 %v646_v33, 0.0  ;;  %v941_v36 = vmax.f32 %v850_v34, 0.0 }
 0x1af   : > { %2075 = vmatmul.msk.f32.gmra.mxu2 %vm474_vm2, %v703_v35  ;;  %v978_v37 = vmul.f32 %v2542_v17, %v941_v36 }
 0x1b1   : > { %v1014_v39 = vsel %vm474_vm2, %v978_v37, 0.0 }
 0x1b2   : > { %v648_v40 = vpop.f32.mrf.mxu1  ;;  %v852_v41 = vpop.f32.mrf.mxu2  ;;  %1015 = vadd.xlane.f32.xlu1 %v1014_v39 }
 0x1b3   : > { %v649_v42 = vadd.f32 %v2464_v38, %v648_v40  ;;  %v853_v43 = vadd.f32 %v2535_v28, %v852_v41 }
 0x1b5   : > { %v704_v44 = vmax.f32 %v649_v42, 0.0  ;;  %v942_v45 = vmax.f32 %v853_v43, 0.0 }
 0x1b7   : > { %2076 = vmatmul.msk.f32.gmra.mxu2 %vm474_vm2, %v704_v44  ;;  %v979_v46 = vmul.f32 %v2542_v17, %v942_v45 }
 0x1b9   : > { %v1017_v47 = vsel %vm474_vm2, %v979_v46, 0.0 }
 0x1ba   : > { %v651_v48 = vpop.f32.mrf.mxu1  ;;  %v855_v49 = vpop.f32.mrf.mxu2  ;;  %1018 = vadd.xlane.f32.xlu1 %v1017_v47 }
 0x1bb   : > { %v652_v50 = vadd.f32 %v2464_v38, %v651_v48  ;;  %v856_v51 = vadd.f32 %v2535_v28, %v855_v49 }
 0x1bd   : > { %v705_v52 = vmax.f32 %v652_v50, 0.0  ;;  %v943_v53 = vmax.f32 %v856_v51, 0.0 }
 0x1bf   : > { %2077 = vmatmul.msk.f32.gmra.mxu2 %vm474_vm2, %v705_v52  ;;  %v980_v54 = vmul.f32 %v2542_v17, %v943_v53 }
 0x1c1   : > { %v1020_v55 = vsel %vm474_vm2, %v980_v54, 0.0 }
 0x1c2   : > { %v654_v56 = vpop.f32.mrf.mxu1  ;;  %v858_v57 = vpop.f32.mrf.mxu2  ;;  %1021 = vadd.xlane.f32.xlu2 %v1020_v55 }
 0x1c3   : > { %v655_v58 = vadd.f32 %v2464_v38, %v654_v56  ;;  %v859_v59 = vadd.f32 %v2535_v28, %v858_v57 }
 0x1c5   : > { %v706_v60 = vmax.f32 %v655_v58, 0.0  ;;  %v944_v61 = vmax.f32 %v859_v59, 0.0 }
 0x1c7   : > { %2078 = vmatmul.msk.f32.gmra.mxu2 %vm474_vm2, %v706_v60  ;;  %v981_v62 = vmul.f32 %v2542_v17, %v944_v61 }
 0x1c9   : > { %v1023_v63 = vsel %vm474_vm2, %v981_v62, 0.0 }
 0x1ca   : > { %v657_v0 = vpop.f32.mrf.mxu1  ;;  %v861_v1 = vpop.f32.mrf.mxu2  ;;  %1024 = vadd.xlane.f32.xlu2 %v1023_v63 }
 0x1cb   : > { %v658_v2 = vadd.f32 %v2464_v38, %v657_v0  ;;  %v862_v3 = vadd.f32 %v2535_v28, %v861_v1 }
 0x1cd   : > { %v707_v4 = vmax.f32 %v658_v2, 0.0  ;;  %v945_v5 = vmax.f32 %v862_v3, 0.0 }
 0x1cf   : > { %2079 = vmatmul.msk.f32.gmra.mxu2 %vm474_vm2, %v707_v4  ;;  %v982_v6 = vmul.f32 %v2542_v17, %v945_v5 }
 0x1d1   : > { %v1026_v7 = vsel %vm474_vm2, %v982_v6, 0.0 }
 0x1d2   : > { %v864_v8 = vpop.f32.mrf.mxu2  ;;  %1027 = vadd.xlane.f32.xlu0 %v1026_v7 }
 0x1d3   : > { %v865_v9 = vadd.f32 %v2535_v28, %v864_v8 }
 0x1d5   : > { %v946_v10 = vmax.f32 %v865_v9, 0.0 }
 0x1d7   : > { %v983_v11 = vmul.f32 %v2542_v17, %v946_v10 }
 0x1d8   : > { %v660_v12 = vpop.f32.mrf.mxu3 }
 0x1d9   : > { %v661_v13 = vadd.f32 %v2464_v38, %v660_v12  ;;  %v1029_v14 = vsel %vm474_vm2, %v983_v11, 0.0  ;;  %v2619_v11 = vld [vmem:[%s2997_s2 + $0x3] ss:$0 sm:$0xff] }
 0x1da   : > { %v867_v15 = vpop.f32.mrf.mxu2  ;;  %1030 = vadd.xlane.f32.xlu1 %v1029_v14 }
 0x1db   : > { %v708_v16 = vmax.f32 %v661_v13, 0.0  ;;  %v868_v18 = vadd.f32 %v2535_v28, %v867_v15 }
 0x1dd   : > { %v947_v19 = vmax.f32 %v868_v18, 0.0  ;;  %2080 = vmatmul.msk.f32.vlgmr.msra.gmra.mxu3 %vm474_vm2, %v708_v16 }
 0x1df   : > { %v984_v20 = vmul.f32 %v2542_v17, %v947_v19 }
 0x1e0   : > { %v663_v21 = vpop.f32.mrf.mxu3 }
 0x1e1   : > { %v664_v22 = vadd.f32 %v2464_v38, %v663_v21  ;;  %v1032_v23 = vsel %vm474_vm2, %v984_v20, 0.0 }
 0x1e2   : > { %v870_v24 = vpop.f32.mrf.mxu2  ;;  %1033 = vadd.xlane.f32.xlu2 %v1032_v23 }
 0x1e3   : > { %v709_v25 = vmax.f32 %v664_v22, 0.0  ;;  %v871_v26 = vadd.f32 %v2535_v28, %v870_v24 }
 0x1e5   : > { %v948_v27 = vmax.f32 %v871_v26, 0.0  ;;  %2081 = vmatmul.msk.f32.gmra.mxu3 %vm474_vm2, %v709_v25 }
 0x1e7   : > { %v985_v29 = vmul.f32 %v2542_v17, %v948_v27 }
 0x1e8   : > { %v666_v30 = vpop.f32.mrf.mxu3 }
 0x1e9   : > { %v667_v31 = vadd.f32 %v2464_v38, %v666_v30  ;;  %v1035_v32 = vsel %vm474_vm2, %v985_v29, 0.0 }
 0x1ea   : > { %v873_v33 = vpop.f32.mrf.mxu2  ;;  %1036 = vadd.xlane.f32.xlu0 %v1035_v32 }
 0x1eb   : > { %v710_v34 = vmax.f32 %v667_v31, 0.0  ;;  %v874_v35 = vadd.f32 %v2535_v28, %v873_v33 }
 0x1ed   : > { %v949_v36 = vmax.f32 %v874_v35, 0.0  ;;  %2082 = vmatmul.msk.f32.gmra.mxu3 %vm474_vm2, %v710_v34 }
 0x1ef   : > { %v986_v37 = vmul.f32 %v2542_v17, %v949_v36 }
 0x1f0   : > { %v669_v39 = vpop.f32.mrf.mxu3 }
 0x1f1   : > { %v670_v40 = vadd.f32 %v2464_v38, %v669_v39  ;;  %v1038_v41 = vsel %vm474_vm2, %v986_v37, 0.0 }
 0x1f2   : > { %v876_v42 = vpop.f32.mrf.mxu2  ;;  %1039 = vadd.xlane.f32.xlu1 %v1038_v41 }
 0x1f3   : > { %v711_v43 = vmax.f32 %v670_v40, 0.0  ;;  %v877_v44 = vadd.f32 %v2535_v28, %v876_v42 }
 0x1f5   : > { %v950_v45 = vmax.f32 %v877_v44, 0.0  ;;  %2083 = vmatmul.msk.f32.gmra.mxu3 %vm474_vm2, %v711_v43 }
 0x1f7   : > { %v987_v46 = vmul.f32 %v2542_v17, %v950_v45 }
 0x1f8   : > { %v672_v47 = vpop.f32.mrf.mxu3 }
 0x1f9   : > { %v673_v48 = vadd.f32 %v2464_v38, %v672_v47  ;;  %v1041_v49 = vsel %vm474_vm2, %v987_v46, 0.0 }
 0x1fa   : > { %v879_v50 = vpop.f32.mrf.mxu2  ;;  %1042 = vadd.xlane.f32.xlu2 %v1041_v49 }
 0x1fb   : > { %v712_v51 = vmax.f32 %v673_v48, 0.0  ;;  %v880_v52 = vadd.f32 %v2535_v28, %v879_v50 }
 0x1fd   : > { %v951_v53 = vmax.f32 %v880_v52, 0.0  ;;  %2084 = vmatmul.msk.f32.gmra.mxu3 %vm474_vm2, %v712_v51 }
 0x1ff   : > { %v988_v54 = vmul.f32 %v2542_v17, %v951_v53 }
 0x200   : > { %v675_v55 = vpop.f32.mrf.mxu3 }
 0x201   : > { %v676_v56 = vadd.f32 %v2464_v38, %v675_v55  ;;  %v1044_v57 = vsel %vm474_vm2, %v988_v54, 0.0 }
 0x202   : > { %v882_v58 = vpop.f32.mrf.mxu2  ;;  %1045 = vadd.xlane.f32.xlu0 %v1044_v57 }
 0x203   : > { %v713_v59 = vmax.f32 %v676_v56, 0.0  ;;  %v883_v60 = vadd.f32 %v2535_v28, %v882_v58 }
 0x205   : > { %v952_v61 = vmax.f32 %v883_v60, 0.0  ;;  %2085 = vmatmul.msk.f32.gmra.mxu3 %vm474_vm2, %v713_v59 }
 0x207   : > { %v989_v62 = vmul.f32 %v2542_v17, %v952_v61 }
 0x208   : > { %v678_v63 = vpop.f32.mrf.mxu3 }
 0x209   : > { %v679_v0 = vadd.f32 %v2464_v38, %v678_v63  ;;  %v1047_v1 = vsel %vm474_vm2, %v989_v62, 0.0 }
 0x20a   : > { %v885_v2 = vpop.f32.mrf.mxu2  ;;  %1048 = vadd.xlane.f32.xlu1 %v1047_v1 }
 0x20b   : > { %v714_v3 = vmax.f32 %v679_v0, 0.0  ;;  %v886_v4 = vadd.f32 %v2535_v28, %v885_v2 }
 0x20d   : > { %v953_v5 = vmax.f32 %v886_v4, 0.0  ;;  %2086 = vmatmul.msk.f32.gmra.mxu3 %vm474_vm2, %v714_v3 }
 0x20f   : > { %v990_v6 = vmul.f32 %v2542_v17, %v953_v5 }
 0x210   : > { %v681_v7 = vpop.f32.mrf.mxu3 }
 0x211   : > { %v682_v8 = vadd.f32 %v2464_v38, %v681_v7  ;;  %v1050_v9 = vsel %vm474_vm2, %v990_v6, 0.0 }
 0x212   : > { %v888_v10 = vpop.f32.mrf.mxu2  ;;  %1051 = vadd.xlane.f32.xlu2 %v1050_v9 }
 0x213   : > { %v715_v12 = vmax.f32 %v682_v8, 0.0  ;;  %v889_v13 = vadd.f32 %v2535_v28, %v888_v10 }
 0x215   : > { %v954_v14 = vmax.f32 %v889_v13, 0.0  ;;  %2087 = vmatmul.msk.f32.gmra.mxu3 %vm474_vm2, %v715_v12  ;;  %v1010_v15 = vpop.xlane.xlu0 %1009 }
 0x216   : > { %v2624_v16 = vadd.f32 %v2619_v11, %v1010_v15 }
 0x217   : > { %v991_v38 = vmul.f32 %v2542_v17, %v954_v14 }
 0x218   : > { %v1139_v18 = vand.u32 2147483647, %v2624_v16  ;;  %vm1779_vm8 = vcmp.ge.f32.partialorder %v2624_v16, 0.0 }
 0x219   : > { %v1053_v19 = vsel %vm474_vm2, %v991_v38, 0.0 }
 0x21a   : > { %v1171_v20 = vsub.f32 0.0, %v1139_v18  ;;  %v891_v21 = vpop.f32.mrf.mxu2  ;;  %1054 = vadd.xlane.f32.xlu0 %v1053_v19 }
 0x21b   : > { %v892_v22 = vadd.f32 %v2535_v28, %v891_v21 }
 0x21c   : > { %v1203_v23 = vmul.f32 1.442695, %v1171_v20 }
 0x21d   : > { %v955_v24 = vmax.f32 %v892_v22, 0.0  ;;  %v1013_v25 = vpop.xlane.xlu0 %1012 }
 0x21e   : > { %2124 = vpow2.f32 %v1203_v23  ;;  %v2631_v26 = vadd.f32 %v2619_v11, %v1013_v25 }
 0x21f   : > { %v992_v27 = vmul.f32 %v2542_v17, %v955_v24 }
 0x220   : > { %v1140_v29 = vand.u32 2147483647, %v2631_v26  ;;  %vm1780_vm13 = vcmp.ge.f32.partialorder %v2631_v26, 0.0 }
 0x221   : > { %v1056_v30 = vsel %vm474_vm2, %v992_v27, 0.0 }
 0x222   : > { %v1172_v31 = vsub.f32 0.0, %v1140_v29  ;;  %v894_v32 = vpop.f32.mrf.mxu2  ;;  %1057 = vadd.xlane.f32.xlu1 %v1056_v30 }
 0x223   : > { %v895_v33 = vadd.f32 %v2535_v28, %v894_v32 }
 0x224   : > { %v2125_v34 = vpop.eup %2124  ;;  %v1205_v35 = vmul.f32 1.442695, %v1172_v31 }
 0x225   : > { %v1267_v36 = vadd.f32 1.0, %v2125_v34  ;;  %v956_v37 = vmax.f32 %v895_v33, 0.0  ;;  %v1016_v39 = vpop.xlane.xlu1 %1015 }
 0x226   : > { %2126 = vpow2.f32 %v1205_v35  ;;  %v2638_v40 = vadd.f32 %v2619_v11, %v1016_v39 }
 0x227   : > { %2128 = vrcp.f32 %v1267_v36  ;;  %v993_v42 = vmul.f32 %v2542_v17, %v956_v37  ;;  %v1308_v58 = vand.u32 2147483647, %v1267_v36  ;;  %v1310_v59 = vand.u32 2147483648, %v1267_v36 }
 0x228   : > { %v1141_v41 = vand.u32 2147483647, %v2638_v40  ;;  %vm1304_vm4 = vweird.f32 %v1267_v36 }
 0x229   : > { %v1059_v45 = vsel %vm474_vm2, %v993_v42, 0.0  ;;  %v1311_v5 = vor.u32 1.1754944e-38, %v1310_v59  ;;  %vm1309_vm6 = vcmp.eq.f32.partialorder %v1308_v58, 8.507059e+37 }
 0x22a   : > { %v1173_v43 = vsub.f32 0.0, %v1141_v41  ;;  %v897_v44 = vpop.f32.mrf.mxu2  ;;  %1060 = vadd.xlane.f32.xlu2 %v1059_v45 }
 0x22b   : > { %v898_v46 = vadd.f32 %v2535_v28, %v897_v44 }
 0x22c   : > { %v2127_v47 = vpop.eup %2126  ;;  %v1207_v48 = vmul.f32 1.442695, %v1173_v43 }
 0x22d   : > { %v2129_v49 = vpop.eup %2128  ;;  %v2644_v50 = vadd.f32 1.0, %v2127_v47  ;;  %v957_v51 = vmax.f32 %v898_v46, 0.0  ;;  %v1019_v52 = vpop.xlane.xlu1 %1018 }
 0x22e   : > { %v1300_v53 = vmul.f32 %v2129_v49, %v1267_v36  ;;  %2130 = vpow2.f32 %v1207_v48  ;;  %v2647_v54 = vadd.f32 %v2619_v11, %v1019_v52  ;;  %vm1305_vm3 = vweird.f32 %v2129_v49 }
 0x22f   : > { %2132 = vrcp.f32 %v2644_v50  ;;  %v994_v57 = vmul.f32 %v2542_v17, %v957_v51  ;;  %vm1306_vm5 = vmor %vm1304_vm4, %vm1305_vm3  ;;  %v1323_v38 = vand.u32 2147483647, %v2644_v50  ;;  %v1325_v18 = vand.u32 2147483648, %v2644_v50 }
 0x230   : > { %v1301_v55 = vsub.f32 1.0, %v1300_v53  ;;  %v1142_v56 = vand.u32 2147483647, %v2647_v54  ;;  %vm1319_vm10 = vweird.f32 %v2644_v50  ;;  %vm1781_vm3 = vcmp.ge.f32.partialorder %v2638_v40, 0.0 }
 0x231   : > { %v1062_v63 = vsel %vm474_vm2, %v994_v57, 0.0  ;;  %v1326_v31 = vor.u32 1.1754944e-38, %v1325_v18  ;;  %vm1324_vm12 = vcmp.eq.f32.partialorder %v1323_v38, 8.507059e+37 }
 0x232   : > { %v1302_v60 = vmul.f32 %v2129_v49, %v1301_v55  ;;  %v1174_v61 = vsub.f32 0.0, %v1142_v56  ;;  %v900_v62 = vpop.f32.mrf.mxu2  ;;  %1063 = vadd.xlane.f32.xlu0 %v1062_v63 }
 0x233   : > { %v901_v0 = vadd.f32 %v2535_v28, %v900_v62 }
 0x234   : > { %v2131_v1 = vpop.eup %2130  ;;  %v1303_v2 = vadd.f32 %v2129_v49, %v1302_v60  ;;  %v1209_v3 = vmul.f32 1.442695, %v1174_v61 }
 0x235   : > { %v2133_v4 = vpop.eup %2132  ;;  %v2654_v6 = vadd.f32 1.0, %v2131_v1  ;;  %v958_v7 = vmax.f32 %v901_v0, 0.0  ;;  %v1022_v8 = vpop.xlane.xlu2 %1021 }
 0x236   : > { %v1307_v9 = vsel %vm1306_vm5, %v2129_v49, %v1303_v2  ;;  %v1315_v10 = vmul.f32 %v2133_v4, %v2644_v50  ;;  %2134 = vpow2.f32 %v1209_v3  ;;  %v2666_v15 = vadd.f32 %v2619_v11, %v1022_v8 }
 0x237   : > { %v1312_v12 = vsel %vm1309_vm6, %v1311_v5, %v1307_v9  ;;  %2136 = vrcp.f32 %v2654_v6  ;;  %v995_v19 = vmul.f32 %v2542_v17, %v958_v7  ;;  %vm1320_vm9 = vweird.f32 %v2133_v4 }
 0x238   : > { %v1811_v13 = vsub.f32 1.0, %v1312_v12  ;;  %v1316_v14 = vsub.f32 1.0, %v1315_v10  ;;  %v1143_v22 = vand.u32 2147483647, %v2666_v15  ;;  %vm1321_vm11 = vmor %vm1319_vm10, %vm1320_vm9  ;;  %v1340_v43 = vand.u32 2147483648, %v2654_v6 }
 0x239   : > { %v1065_v25 = vsel %vm474_vm2, %v995_v19, 0.0  ;;  %v1338_v48 = vand.u32 2147483647, %v2654_v6  ;;  %vm1334_vm15 = vweird.f32 %v2654_v6  ;;  %vm1782_vm9 = vcmp.ge.f32.partialorder %v2647_v54, 0.0 }
 0x23a   : > { %v1843_v20 = vsel %vm1779_vm8, %v1312_v12, %v1811_v13  ;;  %v1317_v21 = vmul.f32 %v2133_v4, %v1316_v14  ;;  %v903_v23 = vpop.f32.mrf.mxu2  ;;  %v1175_v29 = vsub.f32 0.0, %v1143_v22  ;;  %1066 = vadd.xlane.f32.xlu1 %v1065_v25  ;;  %v1341_v55 = vor.u32 1.1754944e-38, %v1340_v43 }
 0x23b   : > { %1876 = vst.msk [vmem:[%s2663_s22] sm:$0xff] %vm1875_vm7, %v1843_v20  ;;  %v904_v24 = vadd.f32 %v2535_v28, %v903_v23  ;;  %vm1339_vm1 = vcmp.eq.f32.partialorder %v1338_v48, 8.507059e+37 }
 0x23c   : > { %v2135_v27 = vpop.eup %2134  ;;  %v1318_v16 = vadd.f32 %v2133_v4, %v1317_v21  ;;  %v1211_v36 = vmul.f32 1.442695, %v1175_v29 }
 0x23d   : > { %v2137_v30 = vpop.eup %2136  ;;  %v2678_v32 = vadd.f32 1.0, %v2135_v27  ;;  %v959_v33 = vmax.f32 %v904_v24, 0.0  ;;  %v1025_v37 = vpop.xlane.xlu2 %1024 }
 0x23e   : > { %v1322_v34 = vsel %vm1321_vm11, %v2133_v4, %v1318_v16  ;;  %v1330_v35 = vmul.f32 %v2137_v30, %v2654_v6  ;;  %v2685_v44 = vadd.f32 %v2619_v11, %v1025_v37  ;;  %vm1335_vm14 = vweird.f32 %v2137_v30 }
 0x23f   : > { %v1327_v39 = vsel %vm1324_vm12, %v1326_v31, %v1322_v34  ;;  %2138 = vrcp.f32 %v2678_v32  ;;  %v996_v45 = vmul.f32 %v2542_v17, %v959_v33  ;;  %vm1336_vm0 = vmor %vm1334_vm15, %vm1335_vm14  ;;  %v1353_v6 = vand.u32 2147483647, %v2678_v32 }
 0x240   : > { %v1812_v41 = vsub.f32 1.0, %v1327_v39  ;;  %v1331_v42 = vsub.f32 1.0, %v1330_v35  ;;  %2140 = vpow2.f32 %v1211_v36  ;;  %v1144_v50 = vand.u32 2147483647, %v2685_v44 }
 0x241   : > { %v1068_v26 = vsel %vm474_vm2, %v996_v45, 0.0  ;;  %v1355_v7 = vand.u32 2147483648, %v2678_v32  ;;  %vm1349_vm5 = vweird.f32 %v2678_v32  ;;  %vm1354_vm8 = vcmp.eq.f32.partialorder %v1353_v6, 8.507059e+37 }
 0x242   : > { %v1844_v46 = vsel %vm1780_vm13, %v1327_v39, %v1812_v41  ;;  %v1332_v47 = vmul.f32 %v2137_v30, %v1331_v42  ;;  %v906_v49 = vpop.f32.mrf.mxu2  ;;  %1069 = vadd.xlane.f32.xlu2 %v1068_v26  ;;  %v1176_v56 = vsub.f32 0.0, %v1144_v50  ;;  %vm1783_vm14 = vcmp.ge.f32.partialorder %v2666_v15, 0.0 }
 0x243   : > { %1877 = vst.msk [vmem:[%s2663_s22 + $0x8] sm:$0xff] %vm1875_vm7, %v1844_v46  ;;  %v907_v51 = vadd.f32 %v2535_v28, %v906_v49  ;;  %v1356_v18 = vor.u32 1.1754944e-38, %v1355_v7 }
 0x244   : > { %v1333_v52 = vadd.f32 %v2137_v30, %v1332_v47  ;;  %v1213_v1 = vmul.f32 1.442695, %v1176_v56 }
 0x245   : > { %v2139_v53 = vpop.eup %2138  ;;  %v960_v57 = vmax.f32 %v907_v51, 0.0  ;;  %v1028_v58 = vpop.xlane.xlu0 %1027 }
 0x246   : > { %v2141_v59 = vpop.eup %2140  ;;  %v1337_v60 = vsel %vm1336_vm0, %v2137_v30, %v1333_v52  ;;  %v1345_v61 = vmul.f32 %v2139_v53, %v2678_v32  ;;  %v2697_v62 = vadd.f32 %v2619_v11, %v1028_v58  ;;  %vm1350_vm4 = vweird.f32 %v2139_v53 }
 0x247   : > { %v1342_v63 = vsel %vm1339_vm1, %v1341_v55, %v1337_v60  ;;  %v2699_v0 = vadd.f32 1.0, %v2141_v59  ;;  %v997_v2 = vmul.f32 %v2542_v17, %v960_v57  ;;  %vm1351_vm6 = vmor %vm1349_vm5, %vm1350_vm4 }
 0x248   : > { %v1813_v3 = vsub.f32 1.0, %v1342_v63  ;;  %v1346_v4 = vsub.f32 1.0, %v1345_v61  ;;  %v1145_v5 = vand.u32 2147483647, %v2697_v62 }
 0x249   : > { %2142 = vrcp.f32 %v2699_v0  ;;  %v1071_v13 = vsel %vm474_vm2, %v997_v2, 0.0  ;;  %v1368_v37 = vand.u32 2147483647, %v2699_v0  ;;  %v1370_v39 = vand.u32 2147483648, %v2699_v0 }
 0x24a   : > { %v1845_v8 = vsel %vm1781_vm3, %v1342_v63, %v1813_v3  ;;  %v1347_v9 = vmul.f32 %v2139_v53, %v1346_v4  ;;  %2144 = vpow2.f32 %v1213_v1  ;;  %v1177_v10 = vsub.f32 0.0, %v1145_v5  ;;  %v909_v12 = vpop.f32.mrf.mxu2  ;;  %1072 = vadd.xlane.f32.xlu0 %v1071_v13 }
 0x24b   : > { %1878 = vst.msk [vmem:[%s2663_s22 + $0x10] sm:$0xff] %vm1875_vm7, %v1845_v8  ;;  %v910_v40 = vadd.f32 %v2535_v28, %v909_v12  ;;  %vm1364_vm11 = vweird.f32 %v2699_v0  ;;  %v1371_v50 = vor.u32 1.1754944e-38, %v1370_v39  ;;  %vm1369_vm13 = vcmp.eq.f32.partialorder %v1368_v37, 8.507059e+37 }
 0x24c   : > { %v1348_v14 = vadd.f32 %v2139_v53, %v1347_v9  ;;  %v1215_v38 = vmul.f32 1.442695, %v1177_v10 }
 0x24d   : > { %v961_v19 = vmax.f32 %v910_v40, 0.0  ;;  %v1031_v20 = vpop.xlane.xlu1 %1030 }
 0x24e   : > { %v1352_v21 = vsel %vm1351_vm6, %v2139_v53, %v1348_v14  ;;  %2146 = vpow2.f32 %v1215_v38  ;;  %v2714_v22 = vadd.f32 %v2619_v11, %v1031_v20  ;;  %vm1784_vm6 = vcmp.ge.f32.partialorder %v2685_v44, 0.0 }
 0x24f   : > { %v2143_v23 = vpop.eup %2142  ;;  %v1357_v24 = vsel %vm1354_vm8, %v1356_v18, %v1352_v21  ;;  %v998_v25 = vmul.f32 %v2542_v17, %v961_v19 }
 0x250   : > { %v2145_v27 = vpop.eup %2144  ;;  %v1814_v16 = vsub.f32 1.0, %v1357_v24  ;;  %v1360_v29 = vmul.f32 %v2143_v23, %v2699_v0  ;;  %v1146_v30 = vand.u32 2147483647, %v2714_v22  ;;  %vm1365_vm10 = vweird.f32 %v2143_v23 }
 0x251   : > { %v1272_v31 = vadd.f32 1.0, %v2145_v27  ;;  %v1074_v32 = vsel %vm474_vm2, %v998_v25, 0.0  ;;  %vm1366_vm12 = vmor %vm1364_vm11, %vm1365_vm10  ;;  %vm1785_vm10 = vcmp.ge.f32.partialorder %v2697_v62, 0.0 }
 0x252   : > { %v1846_v33 = vsel %vm1782_vm9, %v1357_v24, %v1814_v16  ;;  %v1361_v34 = vsub.f32 1.0, %v1360_v29  ;;  %v1178_v35 = vsub.f32 0.0, %v1146_v30  ;;  %v912_v36 = vpop.f32.mrf.mxu2  ;;  %1075 = vadd.xlane.f32.xlu1 %v1074_v32 }
 0x253   : > { %1879 = vst.msk [vmem:[%s2663_s22 + $0x18] sm:$0xff] %vm1875_vm7, %v1846_v33  ;;  %2148 = vrcp.f32 %v1272_v31  ;;  %v913_v54 = vadd.f32 %v2535_v28, %v912_v36  ;;  %v1383_v0 = vand.u32 2147483647, %v1272_v31  ;;  %v1385_v3 = vand.u32 2147483648, %v1272_v31 }
 0x254   : > { %v2147_v41 = vpop.eup %2146  ;;  %v1362_v42 = vmul.f32 %v2143_v23, %v1361_v34  ;;  %v1217_v43 = vmul.f32 1.442695, %v1178_v35  ;;  %vm1379_vm0 = vweird.f32 %v1272_v31 }
 0x255   : > { %v2727_v45 = vadd.f32 1.0, %v2147_v41  ;;  %v1034_v46 = vpop.xlane.xlu2 %1033  ;;  %v962_v48 = vmax.f32 %v913_v54, 0.0  ;;  %vm1384_vm1 = vcmp.eq.f32.partialorder %v1383_v0, 8.507059e+37  ;;  %v1386_v12 = vor.u32 1.1754944e-38, %v1385_v3 }
 0x256   : > { %v1363_v47 = vadd.f32 %v2143_v23, %v1362_v42  ;;  %2150 = vpow2.f32 %v1217_v43  ;;  %v2730_v49 = vadd.f32 %v2619_v11, %v1034_v46 }
 0x257   : > { %2152 = vrcp.f32 %v2727_v45  ;;  %v999_v52 = vmul.f32 %v2542_v17, %v962_v48  ;;  %v1398_v40 = vand.u32 2147483647, %v2727_v45  ;;  %v1400_v13 = vand.u32 2147483648, %v2727_v45 }
 0x258   : > { %v1367_v51 = vsel %vm1366_vm12, %v2143_v23, %v1363_v47  ;;  %v1147_v26 = vand.u32 2147483647, %v2730_v49  ;;  %vm1394_vm5 = vweird.f32 %v2727_v45 }
 0x259   : > { %v2149_v53 = vpop.eup %2148  ;;  %v1372_v55 = vsel %vm1369_vm13, %v1371_v50, %v1367_v51  ;;  %v1077_v59 = vsel %vm474_vm2, %v999_v52, 0.0  ;;  %v1401_v29 = vor.u32 1.1754944e-38, %v1400_v13  ;;  %vm1399_vm9 = vcmp.eq.f32.partialorder %v1398_v40, 8.507059e+37 }
 0x25a   : > { %v1815_v56 = vsub.f32 1.0, %v1372_v55  ;;  %v1375_v57 = vmul.f32 %v2149_v53, %v1272_v31  ;;  %v1179_v58 = vsub.f32 0.0, %v1147_v26  ;;  %1078 = vadd.xlane.f32.xlu2 %v1077_v59  ;;  %vm1380_vm15 = vweird.f32 %v2149_v53 }
 0x25b   : > { %vm1381_vm3 = vmor %vm1379_vm0, %vm1380_vm15  ;;  %vm1786_vm15 = vcmp.ge.f32.partialorder %v2714_v22, 0.0 }
 0x25c   : > { %v2151_v60 = vpop.eup %2150  ;;  %v1847_v61 = vsel %vm1783_vm14, %v1372_v55, %v1815_v56  ;;  %v1376_v63 = vsub.f32 1.0, %v1375_v57  ;;  %v1219_v1 = vmul.f32 1.442695, %v1179_v58 }
 0x25d   : > { %v2153_v2 = vpop.eup %2152  ;;  %1880 = vst.msk [vmem:[%s2663_s22 + $0x20] sm:$0xff] %vm1875_vm7, %v1847_v61  ;;  %v2739_v4 = vadd.f32 1.0, %v2151_v60  ;;  %v1037_v5 = vpop.xlane.xlu0 %1036 }
 0x25e   : > { %v1377_v6 = vmul.f32 %v2149_v53, %v1376_v63  ;;  %v1390_v7 = vmul.f32 %v2153_v2, %v2727_v45  ;;  %2154 = vpow2.f32 %v1219_v1  ;;  %v2744_v9 = vadd.f32 %v2619_v11, %v1037_v5 }
 0x25f   : > { %2156 = vrcp.f32 %v2739_v4  ;;  %vm1395_vm4 = vweird.f32 %v2153_v2  ;;  %v1413_v39 = vand.u32 2147483647, %v2739_v4  ;;  %v1415_v43 = vand.u32 2147483648, %v2739_v4 }
 0x260   : > { %v1378_v15 = vadd.f32 %v2149_v53, %v1377_v6  ;;  %v1391_v8 = vsub.f32 1.0, %v1390_v7  ;;  %v915_v10 = vpop.f32.mrf.mxu3  ;;  %v1148_v19 = vand.u32 2147483647, %v2744_v9  ;;  %vm1396_vm8 = vmor %vm1394_vm5, %vm1395_vm4  ;;  %vm1409_vm12 = vweird.f32 %v2739_v4 }
 0x261   : > { %v916_v14 = vadd.f32 %v2535_v28, %v915_v10  ;;  %v1416_v52 = vor.u32 1.1754944e-38, %v1415_v43  ;;  %vm1414_vm14 = vcmp.eq.f32.partialorder %v1413_v39, 8.507059e+37  ;;  %vm1787_vm5 = vcmp.ge.f32.partialorder %v2730_v49, 0.0 }
 0x262   : > { %v1382_v38 = vsel %vm1381_vm3, %v2149_v53, %v1378_v15  ;;  %v1392_v18 = vmul.f32 %v2153_v2, %v1391_v8  ;;  %v1180_v27 = vsub.f32 0.0, %v1148_v19 }
 0x263   : > { %v1387_v20 = vsel %vm1384_vm1, %v1386_v12, %v1382_v38  ;;  %v963_v21 = vmax.f32 %v916_v14, 0.0 }
 0x264   : > { %v2155_v23 = vpop.eup %2154  ;;  %v1816_v24 = vsub.f32 1.0, %v1387_v20  ;;  %v1393_v25 = vadd.f32 %v2153_v2, %v1392_v18  ;;  %v1221_v41 = vmul.f32 1.442695, %v1180_v27 }
 0x265   : > { %v2157_v16 = vpop.eup %2156  ;;  %v2752_v30 = vadd.f32 1.0, %v2155_v23  ;;  %v1000_v31 = vmul.f32 %v2542_v17, %v963_v21  ;;  %v1040_v35 = vpop.xlane.xlu1 %1039 }
 0x266   : > { %v1848_v32 = vsel %vm1784_vm6, %v1387_v20, %v1816_v24  ;;  %v1397_v33 = vsel %vm1396_vm8, %v2153_v2, %v1393_v25  ;;  %v1405_v34 = vmul.f32 %v2157_v16, %v2739_v4  ;;  %v2763_v54 = vadd.f32 %v2619_v11, %v1040_v35 }
 0x267   : > { %1881 = vst.msk [vmem:[%s2663_s22 + $0x28] sm:$0xff] %vm1875_vm7, %v1848_v32  ;;  %v1402_v36 = vsel %vm1399_vm9, %v1401_v29, %v1397_v33  ;;  %2158 = vrcp.f32 %v2752_v30  ;;  %v1080_v46 = vsel %vm474_vm2, %v1000_v31, 0.0  ;;  %vm1410_vm11 = vweird.f32 %v2157_v16 }
 0x268   : > { %v1817_v44 = vsub.f32 1.0, %v1402_v36  ;;  %v1406_v37 = vsub.f32 1.0, %v1405_v34  ;;  %v918_v42 = vpop.f32.mrf.mxu3  ;;  %2160 = vpow2.f32 %v1221_v41  ;;  %1081 = vadd.xlane.f32.xlu0 %v1080_v46  ;;  %v1149_v48 = vand.u32 2147483647, %v2763_v54  ;;  %vm1411_vm13 = vmor %vm1409_vm12, %vm1410_vm11 }
 0x269   : > { %v919_v45 = vadd.f32 %v2535_v28, %v918_v42  ;;  %v1428_v3 = vand.u32 2147483647, %v2752_v30  ;;  %v1430_v6 = vand.u32 2147483648, %v2752_v30  ;;  %vm1424_vm1 = vweird.f32 %v2752_v30 }
 0x26a   : > { %v1849_v47 = vsel %vm1785_vm10, %v1402_v36, %v1817_v44  ;;  %v1407_v62 = vmul.f32 %v2157_v16, %v1406_v37  ;;  %v1181_v53 = vsub.f32 0.0, %v1149_v48  ;;  %vm1788_vm11 = vcmp.ge.f32.partialorder %v2744_v9, 0.0 }
 0x26b   : > { %1882 = vst.msk [vmem:[%s2663_s22 + $0x30] sm:$0xff] %vm1875_vm7, %v1849_v47  ;;  %v964_v50 = vmax.f32 %v919_v45, 0.0  ;;  %vm1429_vm4 = vcmp.eq.f32.partialorder %v1428_v3, 8.507059e+37  ;;  %v1431_v14 = vor.u32 1.1754944e-38, %v1430_v6 }
 0x26c   : > { %v1408_v51 = vadd.f32 %v2157_v16, %v1407_v62  ;;  %v1223_v61 = vmul.f32 1.442695, %v1181_v53  ;;  %v2810_v53 = vld [vmem:[%s2997_s2 + $0x2] ss:$0 sm:$0xff] }
 0x26d   : > { %v2159_v26 = vpop.eup %2158  ;;  %v1043_v55 = vpop.xlane.xlu2 %1042  ;;  %v1001_v56 = vmul.f32 %v2542_v17, %v964_v50 }
 0x26e   : > { %v1412_v57 = vsel %vm1411_vm13, %v2157_v16, %v1408_v51  ;;  %v1420_v58 = vmul.f32 %v2159_v26, %v2752_v30  ;;  %v2774_v59 = vadd.f32 %v2619_v11, %v1043_v55  ;;  %v2161_v0 = vpop.eup %2160  ;;  %2162 = vpow2.f32 %v1223_v61 }
 0x26f   : > { %v1417_v60 = vsel %vm1414_vm14, %v1416_v52, %v1412_v57  ;;  %v1083_v63 = vsel %vm474_vm2, %v1001_v56, 0.0  ;;  %v1276_v7 = vadd.f32 1.0, %v2161_v0  ;;  %vm1425_vm0 = vweird.f32 %v2159_v26 }
 0x270   : > { %v1818_v1 = vsub.f32 1.0, %v1417_v60  ;;  %v1421_v2 = vsub.f32 1.0, %v1420_v58  ;;  %v1150_v4 = vand.u32 2147483647, %v2774_v59  ;;  %v921_v5 = vpop.f32.mrf.mxu3  ;;  %1084 = vadd.xlane.f32.xlu1 %v1083_v63  ;;  %vm1426_vm3 = vmor %vm1424_vm1, %vm1425_vm0  ;;  %vm1789_vm1 = vcmp.ge.f32.partialorder %v2763_v54, 0.0 }
 0x271   : > { %v922_v15 = vadd.f32 %v2535_v28, %v921_v5  ;;  %2164 = vrcp.f32 %v1276_v7  ;;  %v1443_v37 = vand.u32 2147483647, %v1276_v7  ;;  %v1445_v39 = vand.u32 2147483648, %v1276_v7 }
 0x272   : > { %v1850_v22 = vsel %vm1786_vm15, %v1417_v60, %v1818_v1  ;;  %v1422_v8 = vmul.f32 %v2159_v26, %v1421_v2  ;;  %v1182_v10 = vsub.f32 0.0, %v1150_v4  ;;  %vm1439_vm8 = vweird.f32 %v1276_v7 }
 0x273   : > { %1883 = vst.msk [vmem:[%s2663_s22 + $0x38] sm:$0xff] %vm1875_vm7, %v1850_v22  ;;  %v965_v13 = vmax.f32 %v922_v15, 0.0  ;;  %vm1444_vm10 = vcmp.eq.f32.partialorder %v1443_v37, 8.507059e+37  ;;  %v1446_v50 = vor.u32 1.1754944e-38, %v1445_v39 }
 0x274   : > { %v1423_v12 = vadd.f32 %v2159_v26, %v1422_v8  ;;  %v1225_v40 = vmul.f32 1.442695, %v1182_v10  ;;  %v2163_v21 = vpop.eup %2162 }
 0x275   : > { %v1046_v38 = vpop.xlane.xlu0 %1045  ;;  %v1002_v20 = vmul.f32 %v2542_v17, %v965_v13  ;;  %v2789_v25 = vadd.f32 1.0, %v2163_v21 }
 0x276   : > { %v1427_v18 = vsel %vm1426_vm3, %v2159_v26, %v1423_v12  ;;  %2166 = vpow2.f32 %v1225_v40  ;;  %v2786_v19 = vadd.f32 %v2619_v11, %v1046_v38 }
 0x277   : > { %v1432_v23 = vsel %vm1429_vm4, %v1431_v14, %v1427_v18  ;;  %v2165_v29 = vpop.eup %2164  ;;  %v1086_v31 = vsel %vm474_vm2, %v1002_v20, 0.0  ;;  %2168 = vrcp.f32 %v2789_v25  ;;  %v1458_v60 = vand.u32 2147483647, %v2789_v25 }
 0x278   : > { %v1819_v24 = vsub.f32 1.0, %v1432_v23  ;;  %v1151_v27 = vand.u32 2147483647, %v2786_v19  ;;  %v924_v16 = vpop.f32.mrf.mxu3  ;;  %v1435_v33 = vmul.f32 %v2165_v29, %v1276_v7  ;;  %1087 = vadd.xlane.f32.xlu2 %v1086_v31  ;;  %vm1440_vm6 = vweird.f32 %v2165_v29 }
 0x279   : > { %v925_v30 = vadd.f32 %v2535_v28, %v924_v16  ;;  %vm1441_vm9 = vmor %vm1439_vm8, %vm1440_vm6  ;;  %v1460_v63 = vand.u32 2147483648, %v2789_v25  ;;  %vm1454_vm13 = vweird.f32 %v2789_v25  ;;  %vm1459_vm15 = vcmp.eq.f32.partialorder %v1458_v60, 8.507059e+37 }
 0x27a   : > { %v1851_v32 = vsel %vm1787_vm5, %v1432_v23, %v1819_v24  ;;  %v1183_v34 = vsub.f32 0.0, %v1151_v27  ;;  %v1436_v36 = vsub.f32 1.0, %v1435_v33  ;;  %vm1790_vm6 = vcmp.ge.f32.partialorder %v2774_v59, 0.0 }
 0x27b   : > { %1884 = vst.msk [vmem:[%s2663_s22 + $0x40] sm:$0xff] %vm1875_vm7, %v1851_v32  ;;  %v966_v44 = vmax.f32 %v925_v30, 0.0  ;;  %v1461_v9 = vor.u32 1.1754944e-38, %v1460_v63 }
 0x27c   : > { %v2167_v35 = vpop.eup %2166  ;;  %v1227_v49 = vmul.f32 1.442695, %v1183_v34  ;;  %v1437_v28 = vmul.f32 %v2165_v29, %v1436_v36 }
 0x27d   : > { %v2798_v41 = vadd.f32 1.0, %v2167_v35  ;;  %v1049_v42 = vpop.xlane.xlu1 %1048  ;;  %v1003_v45 = vmul.f32 %v2542_v17, %v966_v44  ;;  %v2169_v46 = vpop.eup %2168 }
 0x27e   : > { %v2801_v43 = vadd.f32 %v2619_v11, %v1049_v42  ;;  %v1438_v47 = vadd.f32 %v2165_v29, %v1437_v28  ;;  %v1450_v51 = vmul.f32 %v2169_v46, %v2789_v25  ;;  %vm1455_vm12 = vweird.f32 %v2169_v46 }
 0x27f   : > { %2170 = vrcp.f32 %v2798_v41  ;;  %v1089_v56 = vsel %vm474_vm2, %v1003_v45, 0.0  ;;  %vm1456_vm14 = vmor %vm1454_vm13, %vm1455_vm12  ;;  %v1473_v14 = vand.u32 2147483647, %v2798_v41  ;;  %v1475_v38 = vand.u32 2147483648, %v2798_v41 }
 0x280   : > { %2172 = vpow2.f32 %v1227_v49  ;;  %v1152_v62 = vand.u32 2147483647, %v2801_v43  ;;  %v927_v48 = vpop.f32.mrf.mxu3  ;;  %v1442_v26 = vsel %vm1441_vm9, %v2165_v29, %v1438_v47  ;;  %v1451_v58 = vsub.f32 1.0, %v1450_v51  ;;  %1090 = vadd.xlane.f32.xlu0 %v1089_v56 }
 0x281   : > { %v928_v55 = vadd.f32 %v2810_v53, %v927_v48  ;;  %v1447_v57 = vsel %vm1444_vm10, %v1446_v50, %v1442_v26  ;;  %vm1469_vm3 = vweird.f32 %v2798_v41  ;;  %v1476_v31 = vor.u32 1.1754944e-38, %v1475_v38 }
 0x282   : > { %v1184_v52 = vsub.f32 0.0, %v1152_v62  ;;  %v1820_v61 = vsub.f32 1.0, %v1447_v57  ;;  %v1452_v3 = vmul.f32 %v2169_v46, %v1451_v58  ;;  %vm1474_vm5 = vcmp.eq.f32.partialorder %v1473_v14, 8.507059e+37 }
 0x283   : > { %v967_v1 = vmax.f32 %v928_v55, 0.0  ;;  %vm1791_vm13 = vcmp.ge.f32.partialorder %v2786_v19, 0.0 }
 0x284   : > { %v1229_v0 = vmul.f32 1.442695, %v1184_v52  ;;  %v1852_v6 = vsel %vm1788_vm11, %v1447_v57, %v1820_v61  ;;  %v1453_v15 = vadd.f32 %v2169_v46, %v1452_v3 }
 0x285   : > { %v2171_v2 = vpop.eup %2170  ;;  %v1052_v4 = vpop.xlane.xlu2 %1051  ;;  %1885 = vst.msk [vmem:[%s2663_s22 + $0x48] sm:$0xff] %vm1875_vm7, %v1852_v6  ;;  %v1004_v40 = vmul.f32 %v2542_v17, %v967_v1 }
 0x286   : > { %v2173_v5 = vpop.eup %2172  ;;  %v1465_v7 = vmul.f32 %v2171_v2, %v2798_v41  ;;  %2174 = vpow2.f32 %v1229_v0  ;;  %v2824_v8 = vadd.f32 %v2619_v11, %v1052_v4  ;;  %v1457_v13 = vsel %vm1456_vm14, %v2169_v46, %v1453_v15 }
 0x287   : > { %v2821_v22 = vadd.f32 1.0, %v2173_v5  ;;  %v1462_v18 = vsel %vm1459_vm15, %v1461_v9, %v1457_v13  ;;  %vm1470_vm0 = vweird.f32 %v2171_v2  ;;  %v1092_v29 = vsel %vm474_vm2, %v1004_v40, 0.0 }
 0x288   : > { %v1466_v10 = vsub.f32 1.0, %v1465_v7  ;;  %v930_v12 = vpop.f32.mrf.mxu3  ;;  %v1153_v21 = vand.u32 2147483647, %v2824_v8  ;;  %v1821_v23 = vsub.f32 1.0, %v1462_v18  ;;  %vm1471_vm4 = vmor %vm1469_vm3, %vm1470_vm0  ;;  %1093 = vadd.xlane.f32.xlu1 %v1092_v29 }
 0x289   : > { %2176 = vrcp.f32 %v2821_v22  ;;  %v931_v24 = vadd.f32 %v2810_v53, %v930_v12  ;;  %v1488_v46 = vand.u32 2147483647, %v2821_v22  ;;  %v1490_v62 = vand.u32 2147483648, %v2821_v22 }
 0x28a   : > { %v1467_v20 = vmul.f32 %v2171_v2, %v1466_v10  ;;  %v1185_v16 = vsub.f32 0.0, %v1153_v21  ;;  %v1853_v30 = vsel %vm1789_vm1, %v1462_v18, %v1821_v23  ;;  %vm1484_vm9 = vweird.f32 %v2821_v22 }
 0x28b   : > { %1886 = vst.msk [vmem:[%s2663_s22 + $0x50] sm:$0xff] %vm1875_vm7, %v1853_v30  ;;  %v968_v37 = vmax.f32 %v931_v24, 0.0  ;;  %vm1489_vm10 = vcmp.eq.f32.partialorder %v1488_v46, 8.507059e+37  ;;  %v1491_v63 = vor.u32 1.1754944e-38, %v1490_v62  ;;  %vm1792_vm1 = vcmp.ge.f32.partialorder %v2801_v43, 0.0 }
 0x28c   : > { %v2175_v25 = vpop.eup %2174  ;;  %v1468_v27 = vadd.f32 %v2171_v2, %v1467_v20  ;;  %v1231_v34 = vmul.f32 1.442695, %v1185_v16 }
 0x28d   : > { %v2835_v32 = vadd.f32 1.0, %v2175_v25  ;;  %v1055_v33 = vpop.xlane.xlu0 %1054  ;;  %v1005_v50 = vmul.f32 %v2542_v17, %v968_v37 }
 0x28e   : > { %v1472_v54 = vsel %vm1471_vm4, %v2171_v2, %v1468_v27  ;;  %v2840_v35 = vadd.f32 %v2619_v11, %v1055_v33 }
 0x28f   : > { %v2177_v36 = vpop.eup %2176  ;;  %v1477_v44 = vsel %vm1474_vm5, %v1476_v31, %v1472_v54  ;;  %2178 = vrcp.f32 %v2835_v32  ;;  %v1095_v55 = vsel %vm474_vm2, %v1005_v50, 0.0  ;;  %v1503_v0 = vand.u32 2147483647, %v2835_v32 }
 0x290   : > { %v1822_v39 = vsub.f32 1.0, %v1477_v44  ;;  %v1480_v41 = vmul.f32 %v2177_v36, %v2821_v22  ;;  %v933_v49 = vpop.f32.mrf.mxu3  ;;  %2180 = vpow2.f32 %v1231_v34  ;;  %v1154_v42 = vand.u32 2147483647, %v2840_v35  ;;  %1096 = vadd.xlane.f32.xlu2 %v1095_v55 }
 0x291   : > { %v934_v47 = vadd.f32 %v2810_v53, %v933_v49  ;;  %vm1485_vm8 = vweird.f32 %v2177_v36  ;;  %v1505_v15 = vand.u32 2147483648, %v2835_v32  ;;  %vm1499_vm14 = vweird.f32 %v2835_v32 }
 0x292   : > { %v1854_v28 = vsel %vm1790_vm6, %v1477_v44, %v1822_v39  ;;  %v1481_v45 = vsub.f32 1.0, %v1480_v41  ;;  %v1186_v48 = vsub.f32 0.0, %v1154_v42  ;;  %vm1486_vm11 = vmor %vm1484_vm9, %vm1485_vm8  ;;  %vm1504_vm0 = vcmp.eq.f32.partialorder %v1503_v0, 8.507059e+37 }
 0x293   : > { %1887 = vst.msk [vmem:[%s2663_s22 + $0x58] sm:$0xff] %vm1875_vm7, %v1854_v28  ;;  %v969_v26 = vmax.f32 %v934_v47, 0.0  ;;  %v2880_v47 = vld [vmem:[%s2997_s2 + $0x3] ss:$0 sm:$0xff]  ;;  %vm1793_vm8 = vcmp.ge.f32.partialorder %v2824_v8, 0.0 }
 0x294   : > { %v1482_v51 = vmul.f32 %v2177_v36, %v1481_v45  ;;  %v1233_v52 = vmul.f32 1.442695, %v1186_v48 }
 0x295   : > { %v2179_v59 = vpop.eup %2178  ;;  %v1058_v56 = vpop.xlane.xlu1 %1057  ;;  %v1006_v1 = vmul.f32 %v2542_v17, %v969_v26 }
 0x296   : > { %v1483_v57 = vadd.f32 %v2177_v36, %v1482_v51  ;;  %v1495_v58 = vmul.f32 %v2179_v59, %v2835_v32  ;;  %v2856_v60 = vadd.f32 %v2619_v11, %v1058_v56  ;;  %v2181_v61 = vpop.eup %2180  ;;  %2182 = vpow2.f32 %v1233_v52 }
 0x297   : > { %v1281_v4 = vadd.f32 1.0, %v2181_v61  ;;  %v1098_v9 = vsel %vm474_vm2, %v1006_v1, 0.0  ;;  %vm1500_vm12 = vweird.f32 %v2179_v59 }
 0x298   : > { %v1487_v2 = vsel %vm1486_vm11, %v2177_v36, %v1483_v57  ;;  %v1496_v3 = vsub.f32 1.0, %v1495_v58  ;;  %v1155_v5 = vand.u32 2147483647, %v2856_v60  ;;  %v936_v6 = vpop.f32.mrf.mxu3  ;;  %1099 = vadd.xlane.f32.xlu0 %v1098_v9  ;;  %vm1501_vm15 = vmor %vm1499_vm14, %vm1500_vm12  ;;  %vm1794_vm12 = vcmp.ge.f32.partialorder %v2840_v35, 0.0 }
 0x299   : > { %v1492_v7 = vsel %vm1489_vm10, %v1491_v63, %v1487_v2  ;;  %v937_v22 = vadd.f32 %v2810_v53, %v936_v6  ;;  %2184 = vrcp.f32 %v1281_v4  ;;  %v1506_v53 = vor.u32 1.1754944e-38, %v1505_v15 }
 0x29a   : > { %v1823_v10 = vsub.f32 1.0, %v1492_v7  ;;  %v1497_v12 = vmul.f32 %v2179_v59, %v1496_v3  ;;  %v1187_v40 = vsub.f32 0.0, %v1155_v5  ;;  %v1520_v34 = vand.u32 2147483648, %v1281_v4 }
 0x29b   : > { %v970_v13 = vmax.f32 %v937_v22, 0.0  ;;  %v1518_v44 = vand.u32 2147483647, %v1281_v4 }
 0x29c   : > { %v1855_v14 = vsel %vm1791_vm13, %v1492_v7, %v1823_v10  ;;  %v1498_v38 = vadd.f32 %v2179_v59, %v1497_v12  ;;  %v2183_v18 = vpop.eup %2182  ;;  %v1235_v20 = vmul.f32 1.442695, %v1187_v40  ;;  %v1521_v28 = vor.u32 1.1754944e-38, %v1520_v34 }
 0x29d   : > { %1888 = vst.msk [vmem:[%s2663_s22 + $0x60] sm:$0xff] %vm1875_vm7, %v1855_v14  ;;  %v1007_v21 = vmul.f32 %v2542_v17, %v970_v13  ;;  %v1282_v24 = vadd.f32 1.0, %v2183_v18  ;;  %v1061_v25 = vpop.xlane.xlu2 %1060  ;;  %vm1519_vm5 = vcmp.eq.f32.partialorder %v1518_v44, 8.507059e+37 }
 0x29e   : > { %v1502_v23 = vsel %vm1501_vm15, %v2179_v59, %v1498_v38  ;;  %2186 = vpow2.f32 %v1235_v20  ;;  %v2870_v27 = vadd.f32 %v2619_v11, %v1061_v25 }
 0x29f   : > { %v1507_v19 = vsel %vm1504_vm0, %v1506_v53, %v1502_v23  ;;  %v1101_v16 = vsel %vm474_vm2, %v1007_v21, 0.0  ;;  %v2185_v29 = vpop.eup %2184  ;;  %2188 = vrcp.f32 %v1282_v24  ;;  %vm1514_vm2 = vweird.f32 %v1281_v4 }
 0x2a0   : > { %v1824_v30 = vsub.f32 1.0, %v1507_v19  ;;  %1102 = vadd.xlane.f32.xlu1 %v1101_v16  ;;  %v1510_v31 = vmul.f32 %v2185_v29, %v1281_v4  ;;  %v1156_v17 = vand.u32 2147483647, %v2870_v27  ;;  %vm1515_vm3 = vweird.f32 %v2185_v29 }
 0x2a1   : > { %vm1516_vm4 = vmor %vm1514_vm2, %vm1515_vm3  ;;  %v1533_v50 = vand.u32 2147483647, %v1282_v24  ;;  %v1535_v51 = vand.u32 2147483648, %v1282_v24  ;;  %vm1529_vm9 = vweird.f32 %v1282_v24 }
 0x2a2   : > { %v1856_v32 = vsel %vm1792_vm1, %v1507_v19, %v1824_v30  ;;  %v1511_v33 = vsub.f32 1.0, %v1510_v31  ;;  %v1188_v54 = vsub.f32 0.0, %v1156_v17  ;;  %vm1795_vm1 = vcmp.ge.f32.partialorder %v2856_v60, 0.0 }
 0x2a3   : > { %1889 = vst.msk [vmem:[%s2663_s22 + $0x68] sm:$0xff] %vm1875_vm7, %v1856_v32  ;;  %v1536_v63 = vor.u32 1.1754944e-38, %v1535_v51  ;;  %vm1534_vm11 = vcmp.eq.f32.partialorder %v1533_v50, 8.507059e+37 }
 0x2a4   : > { %v2187_v36 = vpop.eup %2186  ;;  %v1512_v11 = vmul.f32 %v2185_v29, %v1511_v33  ;;  %v1237_v37 = vmul.f32 1.442695, %v1188_v54 }
 0x2a5   : > { %v2189_v39 = vpop.eup %2188  ;;  %v1283_v41 = vadd.f32 1.0, %v2187_v36  ;;  %v1064_v49 = vpop.xlane.xlu0 %1063 }
 0x2a6   : > { %v1513_v42 = vadd.f32 %v2185_v29, %v1512_v11  ;;  %v1525_v43 = vmul.f32 %v2189_v39, %v1282_v24  ;;  %2190 = vpow2.f32 %v1237_v37  ;;  %v2883_v62 = vadd.f32 %v2880_v47, %v1064_v49 }
 0x2a7   : > { %2192 = vrcp.f32 %v1283_v41  ;;  %vm1530_vm6 = vweird.f32 %v2189_v39  ;;  %v1550_v7 = vand.u32 2147483648, %v1283_v41  ;;  %v1548_v10 = vand.u32 2147483647, %v1283_v41 }
 0x2a8   : > { %v1517_v45 = vsel %vm1516_vm4, %v2185_v29, %v1513_v42  ;;  %v1526_v46 = vsub.f32 1.0, %v1525_v43  ;;  %v1157_v52 = vand.u32 2147483647, %v2883_v62  ;;  %vm1531_vm10 = vmor %vm1529_vm9, %vm1530_vm6  ;;  %vm1544_vm14 = vweird.f32 %v1283_v41 }
 0x2a9   : > { %v1522_v48 = vsel %vm1519_vm5, %v1521_v28, %v1517_v45  ;;  %v1551_v14 = vor.u32 1.1754944e-38, %v1550_v7  ;;  %vm1549_vm0 = vcmp.eq.f32.partialorder %v1548_v10, 8.507059e+37  ;;  %vm1796_vm6 = vcmp.ge.f32.partialorder %v2870_v27, 0.0 }
 0x2aa   : > { %v1825_v26 = vsub.f32 1.0, %v1522_v48  ;;  %v1527_v59 = vmul.f32 %v2189_v39, %v1526_v46  ;;  %v1189_v58 = vsub.f32 0.0, %v1157_v52 }
 0x2ac   : > { %v2191_v55 = vpop.eup %2190  ;;  %v1857_v56 = vsel %vm1793_vm8, %v1522_v48, %v1825_v26  ;;  %v1528_v57 = vadd.f32 %v2189_v39, %v1527_v59  ;;  %v1239_v3 = vmul.f32 1.442695, %v1189_v58 }
 0x2ad   : > { %v2193_v61 = vpop.eup %2192  ;;  %1890 = vst.msk [vmem:[%s2663_s22 + $0x70] sm:$0xff] %vm1875_vm7, %v1857_v56  ;;  %v1284_v0 = vadd.f32 1.0, %v2191_v55  ;;  %v1067_v4 = vpop.xlane.xlu1 %1066 }
 0x2ae   : > { %v1532_v1 = vsel %vm1531_vm10, %v2189_v39, %v1528_v57  ;;  %v1540_v2 = vmul.f32 %v2193_v61, %v1283_v41  ;;  %v2891_v15 = vadd.f32 %v2880_v47, %v1067_v4  ;;  %vm1545_vm13 = vweird.f32 %v2193_v61 }
 0x2af   : > { %v1537_v5 = vsel %vm1534_vm11, %v1536_v63, %v1532_v1  ;;  %2194 = vrcp.f32 %v1284_v0  ;;  %vm1546_vm15 = vmor %vm1544_vm14, %vm1545_vm13  ;;  %v1563_v29 = vand.u32 2147483647, %v1284_v0  ;;  %v1565_v30 = vand.u32 2147483648, %v1284_v0 }
 0x2b0   : > { %v1826_v8 = vsub.f32 1.0, %v1537_v5  ;;  %v1541_v6 = vsub.f32 1.0, %v1540_v2  ;;  %2196 = vpow2.f32 %v1239_v3  ;;  %v1158_v12 = vand.u32 2147483647, %v2891_v15 }
 0x2b1   : > { %vm1559_vm2 = vweird.f32 %v1284_v0  ;;  %v1566_v34 = vor.u32 1.1754944e-38, %v1565_v30  ;;  %vm1564_vm5 = vcmp.eq.f32.partialorder %v1563_v29, 8.507059e+37 }
 0x2b2   : > { %v1858_v22 = vsel %vm1794_vm12, %v1537_v5, %v1826_v8  ;;  %v1542_v9 = vmul.f32 %v2193_v61, %v1541_v6  ;;  %v1190_v38 = vsub.f32 0.0, %v1158_v12  ;;  %vm1797_vm12 = vcmp.ge.f32.partialorder %v2883_v62, 0.0 }
 0x2b3   : > { %1891 = vst.msk [vmem:[%s2663_s22 + $0x78] sm:$0xff] %vm1875_vm7, %v1858_v22 }
 0x2b4   : > { %v1543_v40 = vadd.f32 %v2193_v61, %v1542_v9  ;;  %v1241_v24 = vmul.f32 1.442695, %v1190_v38 }
 0x2b5   : > { %v2195_v13 = vpop.eup %2194  ;;  %v1070_v20 = vpop.xlane.xlu2 %1069 }
 0x2b6   : > { %v2197_v18 = vpop.eup %2196  ;;  %v1547_v35 = vsel %vm1546_vm15, %v2193_v61, %v1543_v40  ;;  %v1555_v53 = vmul.f32 %v2195_v13, %v1284_v0  ;;  %v2897_v25 = vadd.f32 %v2880_v47, %v1070_v20  ;;  %vm1560_vm3 = vweird.f32 %v2195_v13 }
 0x2b7   : > { %v1552_v21 = vsel %vm1549_vm0, %v1551_v14, %v1547_v35  ;;  %v1285_v23 = vadd.f32 1.0, %v2197_v18  ;;  %vm1561_vm4 = vmor %vm1559_vm2, %vm1560_vm3  ;;  %vm1798_vm3 = vcmp.ge.f32.partialorder %v2891_v15, 0.0 }
 0x2b8   : > { %v1827_v19 = vsub.f32 1.0, %v1552_v21  ;;  %v1556_v16 = vsub.f32 1.0, %v1555_v53  ;;  %v1159_v32 = vand.u32 2147483647, %v2897_v25 }
 0x2b9   : > { %2198 = vrcp.f32 %v1285_v23  ;;  %v1580_v48 = vand.u32 2147483648, %v1285_v23  ;;  %v1578_v51 = vand.u32 2147483647, %v1285_v23  ;;  %vm1574_vm9 = vweird.f32 %v1285_v23 }
 0x2ba   : > { %v1859_v31 = vsel %vm1795_vm1, %v1552_v21, %v1827_v19  ;;  %v1557_v17 = vmul.f32 %v2195_v13, %v1556_v16  ;;  %2200 = vpow2.f32 %v1241_v24  ;;  %v1191_v54 = vsub.f32 0.0, %v1159_v32 }
 0x2bb   : > { %1892 = vst.msk [vmem:[%s2663_s22 + $0x80] sm:$0xff] %vm1875_vm7, %v1859_v31  ;;  %v1581_v57 = vor.u32 1.1754944e-38, %v1580_v48  ;;  %vm1579_vm11 = vcmp.eq.f32.partialorder %v1578_v51, 8.507059e+37 }
 0x2bc   : > { %v1558_v33 = vadd.f32 %v2195_v13, %v1557_v17  ;;  %v1243_v60 = vmul.f32 1.442695, %v1191_v54 }
 0x2bd   : > { %v1073_v11 = vpop.xlane.xlu0 %1072 }
 0x2be   : > { %v1562_v36 = vsel %vm1561_vm4, %v2195_v13, %v1558_v33  ;;  %v2904_v39 = vadd.f32 %v2880_v47, %v1073_v11  ;;  %2202 = vpow2.f32 %v1243_v60 }
 0x2bf   : > { %v2199_v44 = vpop.eup %2198  ;;  %v1567_v37 = vsel %vm1564_vm5, %v1566_v34, %v1562_v36 }
 0x2c0   : > { %v2201_v41 = vpop.eup %2200  ;;  %v1828_v49 = vsub.f32 1.0, %v1567_v37  ;;  %v1570_v42 = vmul.f32 %v2199_v44, %v1285_v23  ;;  %v1160_v28 = vand.u32 2147483647, %v2904_v39  ;;  %vm1575_vm8 = vweird.f32 %v2199_v44 }
 0x2c1   : > { %v1286_v43 = vadd.f32 1.0, %v2201_v41  ;;  %vm1576_vm10 = vmor %vm1574_vm9, %vm1575_vm8 }
 0x2c2   : > { %v1860_v45 = vsel %vm1796_vm6, %v1567_v37, %v1828_v49  ;;  %v1571_v46 = vsub.f32 1.0, %v1570_v42  ;;  %v1192_v26 = vsub.f32 0.0, %v1160_v28  ;;  %vm1799_vm6 = vcmp.ge.f32.partialorder %v2897_v25, 0.0 }
 0x2c3   : > { %1893 = vst.msk [vmem:[%s2663_s22 + $0x88] sm:$0xff] %vm1875_vm7, %v1860_v45  ;;  %2204 = vrcp.f32 %v1286_v43  ;;  %v1595_v6 = vand.u32 2147483648, %v1286_v43  ;;  %v1593_v10 = vand.u32 2147483647, %v1286_v43  ;;  %vm1589_vm14 = vweird.f32 %v1286_v43 }
 0x2c4   : > { %v1572_v50 = vmul.f32 %v2199_v44, %v1571_v46  ;;  %v2203_v55 = vpop.eup %2202  ;;  %v1245_v27 = vmul.f32 1.442695, %v1192_v26 }
 0x2c5   : > { %v1076_v59 = vpop.xlane.xlu1 %1075  ;;  %v1287_v58 = vadd.f32 1.0, %v2203_v55  ;;  %v1596_v18 = vor.u32 1.1754944e-38, %v1595_v6  ;;  %vm1594_vm0 = vcmp.eq.f32.partialorder %v1593_v10, 8.507059e+37 }
 0x2c6   : > { %v2911_v52 = vadd.f32 %v2880_v47, %v1076_v59  ;;  %v1573_v56 = vadd.f32 %v2199_v44, %v1572_v50  ;;  %2206 = vpow2.f32 %v1245_v27 }
 0x2c7   : > { %2208 = vrcp.f32 %v1287_v58  ;;  %v1608_v23 = vand.u32 2147483647, %v1287_v58  ;;  %v1610_v24 = vand.u32 2147483648, %v1287_v58  ;;  %vm1604_vm2 = vweird.f32 %v1287_v58 }
 0x2c8   : > { %v1161_v61 = vand.u32 2147483647, %v2911_v52  ;;  %v1577_v63 = vsel %vm1576_vm10, %v2199_v44, %v1573_v56 }
 0x2c9   : > { %v2205_v0 = vpop.eup %2204  ;;  %v1582_v1 = vsel %vm1579_vm11, %v1581_v57, %v1577_v63  ;;  %v1611_v34 = vor.u32 1.1754944e-38, %v1610_v24  ;;  %vm1609_vm5 = vcmp.eq.f32.partialorder %v1608_v23, 8.507059e+37 }
 0x2ca   : > { %v1829_v2 = vsub.f32 1.0, %v1582_v1  ;;  %v1585_v3 = vmul.f32 %v2205_v0, %v1286_v43  ;;  %v1193_v4 = vsub.f32 0.0, %v1161_v61  ;;  %vm1590_vm13 = vweird.f32 %v2205_v0 }
 0x2cb   : > { %vm1591_vm15 = vmor %vm1589_vm14, %vm1590_vm13 }
 0x2cc   : > { %v1861_v5 = vsel %vm1797_vm12, %v1582_v1, %v1829_v2  ;;  %v1586_v8 = vsub.f32 1.0, %v1585_v3  ;;  %v1247_v7 = vmul.f32 1.442695, %v1193_v4  ;;  %v2207_v22 = vpop.eup %2206  ;;  %vm1800_vm12 = vcmp.ge.f32.partialorder %v2904_v39, 0.0 }
 0x2cd   : > { %1894 = vst.msk [vmem:[%s2663_s22 + $0x90] sm:$0xff] %vm1875_vm7, %v1861_v5  ;;  %v1079_v12 = vpop.xlane.xlu2 %1078  ;;  %v2209_v40 = vpop.eup %2208  ;;  %v1288_v13 = vadd.f32 1.0, %v2207_v22 }
 0x2ce   : > { %v1587_v9 = vmul.f32 %v2205_v0, %v1586_v8  ;;  %2210 = vpow2.f32 %v1247_v7  ;;  %v2918_v14 = vadd.f32 %v2880_v47, %v1079_v12  ;;  %v1600_v62 = vmul.f32 %v2209_v40, %v1287_v58 }
 0x2cf   : > { %2212 = vrcp.f32 %v1288_v13  ;;  %vm1605_vm1 = vweird.f32 %v2209_v40  ;;  %v1625_v15 = vand.u32 2147483648, %v1288_v13  ;;  %v1623_v42 = vand.u32 2147483647, %v1288_v13 }
 0x2d0   : > { %v1588_v38 = vadd.f32 %v2205_v0, %v1587_v9  ;;  %v1601_v53 = vsub.f32 1.0, %v1600_v62  ;;  %v1162_v20 = vand.u32 2147483647, %v2918_v14  ;;  %vm1606_vm4 = vmor %vm1604_vm2, %vm1605_vm1  ;;  %vm1619_vm9 = vweird.f32 %v1288_v13 }
 0x2d1   : > { %v1626_v48 = vor.u32 1.1754944e-38, %v1625_v15  ;;  %vm1624_vm11 = vcmp.eq.f32.partialorder %v1623_v42, 8.507059e+37  ;;  %vm1801_vm1 = vcmp.ge.f32.partialorder %v2911_v52, 0.0 }
 0x2d2   : > { %v1592_v35 = vsel %vm1591_vm15, %v2205_v0, %v1588_v38  ;;  %v1602_v16 = vmul.f32 %v2209_v40, %v1601_v53  ;;  %v1194_v29 = vsub.f32 0.0, %v1162_v20 }
 0x2d3   : > { %v1597_v21 = vsel %vm1594_vm0, %v1596_v18, %v1592_v35 }
 0x2d4   : > { %v1830_v19 = vsub.f32 1.0, %v1597_v21  ;;  %v2211_v30 = vpop.eup %2210  ;;  %v1603_v17 = vadd.f32 %v2209_v40, %v1602_v16  ;;  %v1249_v33 = vmul.f32 1.442695, %v1194_v29 }
 0x2d5   : > { %v1289_v32 = vadd.f32 1.0, %v2211_v30  ;;  %v2213_v54 = vpop.eup %2212 }
 0x2d6   : > { %v1862_v31 = vsel %vm1798_vm3, %v1597_v21, %v1830_v19  ;;  %v1607_v36 = vsel %vm1606_vm4, %v2209_v40, %v1603_v17  ;;  %v1615_v60 = vmul.f32 %v2213_v54, %v1288_v13  ;;  %vm1620_vm8 = vweird.f32 %v2213_v54 }
 0x2d7   : > { %1895 = vst.msk [vmem:[%s2663_s22 + $0x98] sm:$0xff] %vm1875_vm7, %v1862_v31  ;;  %2214 = vrcp.f32 %v1289_v32  ;;  %v1612_v11 = vsel %vm1609_vm5, %v1611_v34, %v1607_v36  ;;  %vm1621_vm10 = vmor %vm1619_vm9, %vm1620_vm8  ;;  %v1640_v58 = vand.u32 2147483648, %v1289_v32  ;;  %v1638_v0 = vand.u32 2147483647, %v1289_v32 }
 0x2d8   : > { %v1831_v44 = vsub.f32 1.0, %v1612_v11  ;;  %v1616_v37 = vsub.f32 1.0, %v1615_v60  ;;  %2216 = vpow2.f32 %v1249_v33  ;;  %vm1634_vm14 = vweird.f32 %v1289_v32 }
 0x2d9   : > { %v1641_v5 = vor.u32 1.1754944e-38, %v1640_v58  ;;  %vm1639_vm0 = vcmp.eq.f32.partialorder %v1638_v0, 8.507059e+37 }
 0x2da   : > { %v1863_v41 = vsel %vm1799_vm6, %v1612_v11, %v1831_v44  ;;  %v1617_v49 = vmul.f32 %v2213_v54, %v1616_v37  ;;  %vm1802_vm6 = vcmp.ge.f32.partialorder %v2918_v14, 0.0 }
 0x2db   : > { %v1082_v43 = vpop.xlane.xlu0 %1081  ;;  %1896 = vst.msk [vmem:[%s2663_s22 + $0xa0] sm:$0xff] %vm1875_vm7, %v1863_v41 }
 0x2dc   : > { %v2928_v28 = vadd.f32 %v2880_v47, %v1082_v43  ;;  %v1618_v46 = vadd.f32 %v2213_v54, %v1617_v49 }
 0x2dd   : > { %v2215_v45 = vpop.eup %2214 }
 0x2de   : > { %v1630_v50 = vmul.f32 %v2215_v45, %v1289_v32  ;;  %v1163_v51 = vand.u32 2147483647, %v2928_v28  ;;  %v2217_v25 = vpop.eup %2216  ;;  %v1622_v26 = vsel %vm1621_vm10, %v2213_v54, %v1618_v46  ;;  %vm1635_vm13 = vweird.f32 %v2215_v45 }
 0x2df   : > { %v1627_v59 = vsel %vm1624_vm11, %v1626_v48, %v1622_v26  ;;  %v1290_v56 = vadd.f32 1.0, %v2217_v25  ;;  %vm1636_vm15 = vmor %vm1634_vm14, %vm1635_vm13  ;;  %vm1803_vm13 = vcmp.ge.f32.partialorder %v2928_v28, 0.0 }
 0x2e0   : > { %v1631_v55 = vsub.f32 1.0, %v1630_v50  ;;  %v1195_v27 = vsub.f32 0.0, %v1163_v51  ;;  %v1832_v57 = vsub.f32 1.0, %v1627_v59 }
 0x2e1   : > { %2218 = vrcp.f32 %v1290_v56  ;;  %v1655_v18 = vand.u32 2147483648, %v1290_v56  ;;  %v1653_v21 = vand.u32 2147483647, %v1290_v56  ;;  %vm1649_vm2 = vweird.f32 %v1290_v56 }
 0x2e2   : > { %v1632_v63 = vmul.f32 %v2215_v45, %v1631_v55  ;;  %v1864_v1 = vsel %vm1800_vm12, %v1627_v59, %v1832_v57  ;;  %v1251_v2 = vmul.f32 1.442695, %v1195_v27 }
 0x2e3   : > { %v1085_v61 = vpop.xlane.xlu1 %1084  ;;  %1897 = vst.msk [vmem:[%s2663_s22 + $0xa8] sm:$0xff] %vm1875_vm7, %v1864_v1  ;;  %v1656_v24 = vor.u32 1.1754944e-38, %v1655_v18  ;;  %vm1654_vm5 = vcmp.eq.f32.partialorder %v1653_v21, 8.507059e+37 }
 0x2e4   : > { %v2933_v3 = vadd.f32 %v2880_v47, %v1085_v61  ;;  %v1633_v4 = vadd.f32 %v2215_v45, %v1632_v63  ;;  %2220 = vpow2.f32 %v1251_v2 }
 0x2e6   : > { %v1164_v39 = vand.u32 2147483647, %v2933_v3  ;;  %v1637_v8 = vsel %vm1636_vm15, %v2215_v45, %v1633_v4 }
 0x2e7   : > { %v1642_v6 = vsel %vm1639_vm0, %v1641_v5, %v1637_v8  ;;  %v2219_v22 = vpop.eup %2218 }
 0x2e8   : > { %v1196_v7 = vsub.f32 0.0, %v1164_v39  ;;  %v1833_v9 = vsub.f32 1.0, %v1642_v6  ;;  %v1645_v10 = vmul.f32 %v2219_v22, %v1290_v56  ;;  %vm1650_vm3 = vweird.f32 %v2219_v22 }
 0x2e9   : > { %vm1651_vm4 = vmor %vm1649_vm2, %vm1650_vm3 }
 0x2ea   : > { %v1253_v12 = vmul.f32 1.442695, %v1196_v7  ;;  %v1865_v40 = vsel %vm1801_vm1, %v1642_v6, %v1833_v9  ;;  %v2221_v13 = vpop.eup %2220  ;;  %v1646_v38 = vsub.f32 1.0, %v1645_v10  ;;  %vm1804_vm1 = vcmp.ge.f32.partialorder %v2933_v3, 0.0 }
 0x2eb   : > { %1898 = vst.msk [vmem:[%s2663_s22 + $0xb0] sm:$0xff] %vm1875_vm7, %v1865_v40  ;;  %v1088_v62 = vpop.xlane.xlu2 %1087  ;;  %v1291_v35 = vadd.f32 1.0, %v2221_v13 }
 0x2ec   : > { %2222 = vpow2.f32 %v1253_v12  ;;  %v2942_v53 = vadd.f32 %v2880_v47, %v1088_v62  ;;  %v1647_v20 = vmul.f32 %v2219_v22, %v1646_v38 }
 0x2ed   : > { %2224 = vrcp.f32 %v1291_v35  ;;  %v1670_v44 = vand.u32 2147483648, %v1291_v35  ;;  %v1668_v41 = vand.u32 2147483647, %v1291_v35  ;;  %vm1664_vm9 = vweird.f32 %v1291_v35 }
 0x2ee   : > { %v1648_v23 = vadd.f32 %v2219_v22, %v1647_v20  ;;  %v1165_v52 = vand.u32 2147483647, %v2942_v53 }
 0x2ef   : > { %v1671_v46 = vor.u32 1.1754944e-38, %v1670_v44  ;;  %vm1669_vm11 = vcmp.eq.f32.partialorder %v1668_v41, 8.507059e+37 }
 0x2f0   : > { %v1652_v16 = vsel %vm1651_vm4, %v2219_v22, %v1648_v23  ;;  %v1197_v29 = vsub.f32 0.0, %v1165_v52 }
 0x2f1   : > { %v1657_v30 = vsel %vm1654_vm5, %v1656_v24, %v1652_v16 }
 0x2f2   : > { %v2223_v19 = vpop.eup %2222  ;;  %v1834_v17 = vsub.f32 1.0, %v1657_v30  ;;  %v1255_v32 = vmul.f32 1.442695, %v1197_v29 }
 0x2f3   : > { %v1292_v31 = vadd.f32 1.0, %v2223_v19  ;;  %v2225_v33 = vpop.eup %2224  ;;  %v1091_v54 = vpop.xlane.xlu0 %1090 }
 0x2f4   : > { %v1866_v34 = vsel %vm1802_vm6, %v1657_v30, %v1834_v17  ;;  %v1660_v36 = vmul.f32 %v2225_v33, %v1291_v35  ;;  %v2949_v60 = vadd.f32 %v2880_v47, %v1091_v54  ;;  %vm1665_vm8 = vweird.f32 %v2225_v33 }
 0x2f5   : > { %2226 = vrcp.f32 %v1292_v31  ;;  %1899 = vst.msk [vmem:[%s2663_s22 + $0xb8] sm:$0xff] %vm1875_vm7, %v1866_v34  ;;  %vm1666_vm10 = vmor %vm1664_vm9, %vm1665_vm8  ;;  %v1683_v59 = vand.u32 2147483647, %v1292_v31  ;;  %v1685_v55 = vand.u32 2147483648, %v1292_v31  ;;  %vm1679_vm14 = vweird.f32 %v1292_v31 }
 0x2f6   : > { %2228 = vpow2.f32 %v1255_v32  ;;  %v1661_v11 = vsub.f32 1.0, %v1660_v36  ;;  %v1166_v37 = vand.u32 2147483647, %v2949_v60  ;;  %vm1805_vm6 = vcmp.ge.f32.partialorder %v2942_v53, 0.0 }
 0x2f7   : > { %v1686_v0 = vor.u32 1.1754944e-38, %v1685_v55  ;;  %vm1684_vm0 = vcmp.eq.f32.partialorder %v1683_v59, 8.507059e+37 }
 0x2f8   : > { %v1662_v15 = vmul.f32 %v2225_v33, %v1661_v11  ;;  %v1198_v42 = vsub.f32 0.0, %v1166_v37 }
 0x2fa   : > { %v1663_v43 = vadd.f32 %v2225_v33, %v1662_v15  ;;  %v1257_v50 = vmul.f32 1.442695, %v1198_v42 }
 0x2fb   : > { %v2227_v49 = vpop.eup %2226  ;;  %v1094_v56 = vpop.xlane.xlu1 %1093 }
 0x2fc   : > { %v2229_v14 = vpop.eup %2228  ;;  %v1675_v45 = vmul.f32 %v2227_v49, %v1292_v31  ;;  %v1667_v51 = vsel %vm1666_vm10, %v2225_v33, %v1663_v43  ;;  %vm1680_vm12 = vweird.f32 %v2227_v49  ;;  %v2954_v58 = vadd.f32 %v2880_v47, %v1094_v56 }
 0x2fd   : > { %v1293_v48 = vadd.f32 1.0, %v2229_v14  ;;  %v1672_v26 = vsel %vm1669_vm11, %v1671_v46, %v1667_v51  ;;  %vm1681_vm15 = vmor %vm1679_vm14, %vm1680_vm12  ;;  %vm1806_vm12 = vcmp.ge.f32.partialorder %v2949_v60, 0.0 }
 0x2fe   : > { %v1676_v25 = vsub.f32 1.0, %v1675_v45  ;;  %v1835_v27 = vsub.f32 1.0, %v1672_v26  ;;  %v1167_v1 = vand.u32 2147483647, %v2954_v58 }
 0x2ff   : > { %2230 = vrcp.f32 %v1293_v48  ;;  %v1698_v40 = vand.u32 2147483647, %v1293_v48  ;;  %v1700_v13 = vand.u32 2147483648, %v1293_v48  ;;  %vm1694_vm2 = vweird.f32 %v1293_v48 }
 0x300   : > { %v1677_v57 = vmul.f32 %v2227_v49, %v1676_v25  ;;  %2232 = vpow2.f32 %v1257_v50  ;;  %v1867_v61 = vsel %vm1803_vm13, %v1672_v26, %v1835_v27  ;;  %v1199_v39 = vsub.f32 0.0, %v1167_v1 }
 0x301   : > { %1900 = vst.msk [vmem:[%s2663_s22 + $0xc0] sm:$0xff] %vm1875_vm7, %v1867_v61  ;;  %v1701_v20 = vor.u32 1.1754944e-38, %v1700_v13  ;;  %vm1699_vm5 = vcmp.eq.f32.partialorder %v1698_v40, 8.507059e+37 }
 0x302   : > { %v1678_v63 = vadd.f32 %v2227_v49, %v1677_v57  ;;  %v1259_v22 = vmul.f32 1.442695, %v1199_v39 }
 0x303   : > { %v1097_v12 = vpop.xlane.xlu2 %1096 }
 0x304   : > { %v1682_v2 = vsel %vm1681_vm15, %v2227_v49, %v1678_v63  ;;  %v2963_v62 = vadd.f32 %v2880_v47, %v1097_v12 }
 0x305   : > { %v2231_v4 = vpop.eup %2230  ;;  %v1687_v5 = vsel %vm1684_vm0, %v1686_v0, %v1682_v2 }
 0x306   : > { %v2233_v8 = vpop.eup %2232  ;;  %v1836_v28 = vsub.f32 1.0, %v1687_v5  ;;  %v1690_v6 = vmul.f32 %v2231_v4, %v1293_v48  ;;  %vm1695_vm3 = vweird.f32 %v2231_v4  ;;  %v1168_v3 = vand.u32 2147483647, %v2963_v62 }
 0x307   : > { %v1294_v7 = vadd.f32 1.0, %v2233_v8  ;;  %vm1696_vm4 = vmor %vm1694_vm2, %vm1695_vm3 }
 0x308   : > { %v1868_v9 = vsel %vm1804_vm1, %v1687_v5, %v1836_v28  ;;  %v1691_v10 = vsub.f32 1.0, %v1690_v6  ;;  %v1200_v52 = vsub.f32 0.0, %v1168_v3  ;;  %vm1807_vm1 = vcmp.ge.f32.partialorder %v2954_v58, 0.0 }
 0x309   : > { %1901 = vst.msk [vmem:[%s2663_s22 + $0xc8] sm:$0xff] %vm1875_vm7, %v1868_v9  ;;  %2234 = vrcp.f32 %v1294_v7  ;;  %v1713_v11 = vand.u32 2147483647, %v1294_v7  ;;  %v1715_v44 = vand.u32 2147483648, %v1294_v7  ;;  %vm1709_vm9 = vweird.f32 %v1294_v7 }
 0x30a   : > { %v1692_v38 = vmul.f32 %v2231_v4, %v1691_v10  ;;  %2236 = vpow2.f32 %v1259_v22  ;;  %v1261_v17 = vmul.f32 1.442695, %v1200_v52 }
 0x30b   : > { %v1100_v35 = vpop.xlane.xlu0 %1099  ;;  %v1716_v42 = vor.u32 1.1754944e-38, %v1715_v44  ;;  %vm1714_vm11 = vcmp.eq.f32.partialorder %v1713_v11, 8.507059e+37 }
 0x30c   : > { %v1693_v18 = vadd.f32 %v2231_v4, %v1692_v38  ;;  %v2967_v21 = vadd.f32 %v2880_v47, %v1100_v35  ;;  %2238 = vpow2.f32 %v1261_v17 }
 0x30e   : > { %v1697_v23 = vsel %vm1696_vm4, %v2231_v4, %v1693_v18  ;;  %v1169_v16 = vand.u32 2147483647, %v2967_v21 }
 0x30f   : > { %v2235_v24 = vpop.eup %2234  ;;  %v1702_v19 = vsel %vm1699_vm5, %v1701_v20, %v1697_v23 }
 0x310   : > { %v2237_v29 = vpop.eup %2236  ;;  %v1837_v30 = vsub.f32 1.0, %v1702_v19  ;;  %v1705_v31 = vmul.f32 %v2235_v24, %v1294_v7  ;;  %v1201_v33 = vsub.f32 0.0, %v1169_v16  ;;  %vm1710_vm8 = vweird.f32 %v2235_v24 }
 0x311   : > { %v1295_v32 = vadd.f32 1.0, %v2237_v29  ;;  %vm1711_vm10 = vmor %vm1709_vm9, %vm1710_vm8  ;;  %vm1808_vm9 = vcmp.ge.f32.partialorder %v2963_v62, 0.0 }
 0x312   : > { %v1869_v54 = vsel %vm1805_vm6, %v1702_v19, %v1837_v30  ;;  %v1706_v34 = vsub.f32 1.0, %v1705_v31  ;;  %v1263_v15 = vmul.f32 1.442695, %v1201_v33  ;;  %v2239_v14 = vpop.eup %2238 }
 0x313   : > { %v1103_v36 = vpop.xlane.xlu1 %1102  ;;  %1902 = vst.msk [vmem:[%s2663_s22 + $0xd0] sm:$0xff] %vm1875_vm7, %v1869_v54  ;;  %2240 = vrcp.f32 %v1295_v32  ;;  %v1296_v50 = vadd.f32 1.0, %v2239_v14  ;;  %v1730_v56 = vand.u32 2147483648, %v1295_v32  ;;  %v1728_v61 = vand.u32 2147483647, %v1295_v32 }
 0x314   : > { %v1707_v37 = vmul.f32 %v2235_v24, %v1706_v34  ;;  %v2974_v41 = vadd.f32 %v2880_v47, %v1103_v36  ;;  %2242 = vpow2.f32 %v1263_v15  ;;  %vm1724_vm14 = vweird.f32 %v1295_v32 }
 0x315   : > { %2244 = vrcp.f32 %v1296_v50  ;;  %v1731_v1 = vor.u32 1.1754944e-38, %v1730_v56  ;;  %vm1729_vm0 = vcmp.eq.f32.partialorder %v1728_v61, 8.507059e+37  ;;  %v1743_v7 = vand.u32 2147483647, %v1296_v50 }
 0x316   : > { %v1708_v49 = vadd.f32 %v2235_v24, %v1707_v37  ;;  %v1170_v53 = vand.u32 2147483647, %v2974_v41  ;;  %v1745_v22 = vand.u32 2147483648, %v1296_v50  ;;  %vm1739_vm2 = vweird.f32 %v1296_v50 }
 0x317   : > { %vm1744_vm5 = vcmp.eq.f32.partialorder %v1743_v7, 8.507059e+37 }
 0x318   : > { %v1712_v43 = vsel %vm1711_vm10, %v2235_v24, %v1708_v49  ;;  %v1202_v45 = vsub.f32 0.0, %v1170_v53  ;;  %v1746_v38 = vor.u32 1.1754944e-38, %v1745_v22 }
 0x319   : > { %v2241_v46 = vpop.eup %2240  ;;  %v1717_v48 = vsel %vm1714_vm11, %v1716_v42, %v1712_v43 }
 0x31a   : > { %v1838_v51 = vsub.f32 1.0, %v1717_v48  ;;  %v1720_v25 = vmul.f32 %v2241_v46, %v1295_v32  ;;  %v1265_v26 = vmul.f32 1.442695, %v1202_v45  ;;  %v2243_v47 = vpop.eup %2242  ;;  %vm1725_vm13 = vweird.f32 %v2241_v46 }
 0x31b   : > { %v1297_v27 = vadd.f32 1.0, %v2243_v47  ;;  %v2245_v0 = vpop.eup %2244  ;;  %vm1726_vm15 = vmor %vm1724_vm14, %vm1725_vm13  ;;  %vm1809_vm13 = vcmp.ge.f32.partialorder %v2967_v21, 0.0 }
 0x31c   : > { %v1870_v59 = vsel %vm1806_vm12, %v1717_v48, %v1838_v51  ;;  %v1721_v55 = vsub.f32 1.0, %v1720_v25  ;;  %2246 = vpow2.f32 %v1265_v26  ;;  %v1735_v4 = vmul.f32 %v2245_v0, %v1296_v50 }
 0x31d   : > { %1903 = vst.msk [vmem:[%s2663_s22 + $0xd8] sm:$0xff] %vm1875_vm7, %v1870_v59  ;;  %2248 = vrcp.f32 %v1297_v27  ;;  %vm1740_vm3 = vweird.f32 %v2245_v0  ;;  %v1760_v18 = vand.u32 2147483648, %v1297_v27  ;;  %v1758_v58 = vand.u32 2147483647, %v1297_v27 }
 0x31e   : > { %v1722_v57 = vmul.f32 %v2241_v46, %v1721_v55  ;;  %v1736_v28 = vsub.f32 1.0, %v1735_v4  ;;  %vm1741_vm4 = vmor %vm1739_vm2, %vm1740_vm3  ;;  %vm1754_vm8 = vweird.f32 %v1297_v27 }
 0x31f   : > { %v1761_v16 = vor.u32 1.1754944e-38, %v1760_v18  ;;  %vm1759_vm11 = vcmp.eq.f32.partialorder %v1758_v58, 8.507059e+37 }
 0x320   : > { %v1723_v63 = vadd.f32 %v2241_v46, %v1722_v57  ;;  %v1737_v10 = vmul.f32 %v2245_v0, %v1736_v28 }
 0x322   : > { %v2247_v2 = vpop.eup %2246  ;;  %v1727_v60 = vsel %vm1726_vm15, %v2241_v46, %v1723_v63  ;;  %v1738_v40 = vadd.f32 %v2245_v0, %v1737_v10 }
 0x323   : > { %v1732_v5 = vsel %vm1729_vm0, %v1731_v1, %v1727_v60  ;;  %v1298_v39 = vadd.f32 1.0, %v2247_v2  ;;  %v2249_v6 = vpop.eup %2248 }
 0x324   : > { %v1839_v8 = vsub.f32 1.0, %v1732_v5  ;;  %v1750_v12 = vmul.f32 %v2249_v6, %v1297_v27  ;;  %v1742_v3 = vsel %vm1741_vm4, %v2245_v0, %v1738_v40  ;;  %vm1755_vm6 = vweird.f32 %v2249_v6 }
 0x325   : > { %2250 = vrcp.f32 %v1298_v39  ;;  %v1747_v23 = vsel %vm1744_vm5, %v1746_v38, %v1742_v3  ;;  %vm1756_vm10 = vmor %vm1754_vm8, %vm1755_vm6  ;;  %v1775_v32 = vand.u32 2147483648, %v1298_v39  ;;  %v1773_v34 = vand.u32 2147483647, %v1298_v39 }
 0x326   : > { %v1871_v9 = vsel %vm1807_vm1, %v1732_v5, %v1839_v8  ;;  %v1751_v13 = vsub.f32 1.0, %v1750_v12  ;;  %v1840_v52 = vsub.f32 1.0, %v1747_v23  ;;  %vm1769_vm14 = vweird.f32 %v1298_v39 }
 0x327   : > { %1904 = vst.msk [vmem:[%s2663_s22 + $0xe0] sm:$0xff] %vm1875_vm7, %v1871_v9  ;;  %v1776_v11 = vor.u32 1.1754944e-38, %v1775_v32  ;;  %vm1774_vm0 = vcmp.eq.f32.partialorder %v1773_v34, 8.507059e+37  ;;  %vm1810_vm1 = vcmp.ge.f32.partialorder %v2974_v41, 0.0 }
 0x328   : > { %v1752_v35 = vmul.f32 %v2249_v6, %v1751_v13  ;;  %v1872_v29 = vsel %vm1808_vm9, %v1747_v23, %v1840_v52 }
 0x329   : > { %1905 = vst.msk [vmem:[%s2663_s22 + $0xe8] sm:$0xff] %vm1875_vm7, %v1872_v29 }
 0x32a   : > { %v1753_v24 = vadd.f32 %v2249_v6, %v1752_v35 }
 0x32b   : > { %v2251_v20 = vpop.eup %2250 }
 0x32c   : > { %v1765_v19 = vmul.f32 %v2251_v20, %v1298_v39  ;;  %v1757_v30 = vsel %vm1756_vm10, %v2249_v6, %v1753_v24  ;;  %vm1770_vm12 = vweird.f32 %v2251_v20 }
 0x32d   : > { %v1762_v17 = vsel %vm1759_vm11, %v1761_v16, %v1757_v30  ;;  %vm1771_vm15 = vmor %vm1769_vm14, %vm1770_vm12 }
 0x32e   : > { %v1766_v31 = vsub.f32 1.0, %v1765_v19  ;;  %v1841_v33 = vsub.f32 1.0, %v1762_v17 }
 0x330   : > { %v1767_v54 = vmul.f32 %v2251_v20, %v1766_v31  ;;  %v1873_v36 = vsel %vm1809_vm13, %v1762_v17, %v1841_v33 }
 0x331   : > { %1906 = vst.msk [vmem:[%s2663_s22 + $0xf0] sm:$0xff] %vm1875_vm7, %v1873_v36 }
 0x332   : > { %v1768_v62 = vadd.f32 %v2251_v20, %v1767_v54 }
 0x334   : > { %v1772_v44 = vsel %vm1771_vm15, %v2251_v20, %v1768_v62 }
 0x335   : > { %v1777_v37 = vsel %vm1774_vm0, %v1776_v11, %v1772_v44 }
 0x336   : > { %v1842_v15 = vsub.f32 1.0, %v1777_v37 }
 0x338   : > { %v1874_v49 = vsel %vm1810_vm1, %v1777_v37, %v1842_v15 }
 0x339   : > { %1907 = vst.msk [vmem:[%s2663_s22 + $0xf8] sm:$0xff] %vm1875_vm7, %v1874_v49 }
 0x33a PF: > { %s13_s12 = sadd.s32 1, %s2260_s12  }
 0x33b   : > { %p10_p4 = scmp.ge.s32.totalorder %s13_s12, 5  }
 0x33d   :  { %12 = sbr.rel (!%p10_p4) target bundleno = 1 (0x1), region = 68 }

</bundles_post_ra>
